<compile_context>
chip_gen: v6e
topology: v6e:2x2x1
jax: 0.10.0
libtpu: 0.0.40
codegen_flags: <defaults>
</compile_context>

<pallas_src>
import jax
import jax.numpy as jnp
from jax.experimental import pallas as pl
from jax.experimental.pallas import tpu as pltpu


def _downsample_kernel(x_ref, top_ref, bot_ref, w_ref, o_ref):
    """One row strip of fused conv3x3(pad=1, no bias) + PixelUnshuffle(2).

    x_ref  : (1, TH, W, Cin)    input strip (NHWC)
    top_ref: (1, 1,  W, Cin)    row above the strip (clamped; zeroed at image top)
    bot_ref: (1, 1,  W, Cin)    row below the strip (clamped; zeroed at image bottom)
    w_ref  : (16*Cin, 4*Cout)   fused weights (4x4 stride-2 conv form)
    o_ref  : (1, TH//2, W//2, 4*Cout)  output, channel = (py*2+px)*Cout + c
    """
    _, TH, W, Cin = x_ref.shape
    s = pl.program_id(1)
    ns = pl.num_programs(1)

    x = x_ref[0]                                         # (TH, W, Cin)
    zrow = jnp.zeros((1, W, Cin), x.dtype)
    top = jnp.where(s > 0, top_ref[0], zrow)             # zero pad at image top
    bot = jnp.where(s < ns - 1, bot_ref[0], zrow)        # zero pad at image bottom

    # Padded strip: xp[i, j, :] = input[strip_row i-1, col j-1, :], zeros outside.
    xs = jnp.concatenate([top, x, bot], axis=0)          # (TH+2, W, Cin)
    zcol = jnp.zeros((TH + 2, 1, Cin), x.dtype)
    xp = jnp.concatenate([zcol, xs, zcol], axis=1)       # (TH+2, W+2, Cin)

    # Split even/odd rows & cols so every stride-2 tap becomes a plain slice.
    xr = xp.reshape((TH + 2) // 2, 2, (W + 2) // 2, 2, Cin)
    par = [[xr[:, sy, :, sx, :] for sx in range(2)] for sy in range(2)]

    # im2col patch, built once per strip: channel = (ry*4+rx)*Cin + ci.
    taps = []
    for ry in range(4):
        qy, sy = divmod(ry, 2)
        for rx in range(4):
            qx, sx = divmod(rx, 2)
            taps.append(par[sy][sx][qy:qy + TH // 2, qx:qx + W // 2, :])
    patch = jnp.concatenate(taps, axis=-1)               # (TH//2, W//2, 16*Cin)
    patch = patch.reshape((TH // 2) * (W // 2), 16 * Cin)

    # Single MXU matmul: K = 16*Cin, N = 4*Cout, f32 accumulation.
    out = jnp.dot(patch, w_ref[...], preferred_element_type=jnp.float32)
    # Output is already in its final (pixel-unshuffled) layout.
    o_ref[...] = out.reshape(o_ref.shape).astype(o_ref.dtype)


def _fused_weight(w_oihw):
    """OIHW conv weight (Cout, Cin, 3, 3) -> fused (16*Cin, 4*Cout) matrix.

    conv3x3(pad=1) followed by PixelUnshuffle(2) equals a 4x4 / stride-2 conv
    with 4*Cout outputs.  Rows: (ry*4+rx)*Cin + ci; cols: (py*2+px)*Cout + c.
    """
    Cout, Cin = w_oihw.shape[0], w_oihw.shape[1]
    w_hwio = jnp.transpose(w_oihw, (2, 3, 1, 0))         # (3, 3, Cin, Cout)
    w16 = jnp.zeros((4, 4, Cin, 2, 2, Cout), w_oihw.dtype)
    for py in range(2):
        for px in range(2):
            w16 = w16.at[py:py + 3, px:px + 3, :, py, px, :].set(w_hwio)
    return w16.reshape(16 * Cin, 4 * Cout)


def _pick_strip_rows(H, W, Cin, Cout, itemsize=4, vmem_budget=20 << 20):
    """Largest even divisor of H whose per-strip working set fits the budget."""
    best = 2
    for th in range(2, H + 1, 2):
        if H % th == 0:
            est = th * W * (11 * Cin + 3 * Cout) * itemsize
            if est <= vmem_budget:
                best = th
    return best


def downsample_forward(x_nchw, w_oihw, *, strip_rows=None):
    """Downsample.forward: Conv2d(C, C//2, 3, pad=1, bias=False) + PixelUnshuffle(2).

    x_nchw: (B, C, H, W);  w_oihw: (C//2, C, 3, 3)  ->  (B, 2*C, H//2, W//2).
    """
    B, Cin, H, W = x_nchw.shape
    Cout = w_oihw.shape[0]
    assert w_oihw.shape == (Cout, Cin, 3, 3), w_oihw.shape
    assert H % 2 == 0 and W % 2 == 0, "PixelUnshuffle(2) needs even H, W"

    itemsize = jnp.dtype(x_nchw.dtype).itemsize
    if strip_rows is None:
        strip_rows = _pick_strip_rows(H, W, Cin, Cout, itemsize)
    TH = int(strip_rows)
    assert TH % 2 == 0 and H % TH == 0, "strip_rows must be even and divide H"
    n_strips = H // TH
    Ho, Wo = H // 2, W // 2

    # Layout glue for the torch NCHW interface (the conv itself runs NHWC).
    x_nhwc = jnp.transpose(x_nchw, (0, 2, 3, 1))
    w_mat = _fused_weight(w_oihw)

    est = TH * W * (11 * Cin + 3 * Cout) * itemsize
    vmem_limit = int(min(max(2 * est, 32 << 20), 64 << 20))

    grid_spec = pltpu.PrefetchScalarGridSpec(
        num_scalar_prefetch=0,
        grid=(B, n_strips),
        in_specs=[
            # Current strip.
            pl.BlockSpec((1, TH, W, Cin), lambda b, s: (b, s, 0, 0)),
            # 1-row halos above / below, clamped at the image edges
            # (masked to zero inside the kernel at the boundaries).
            pl.BlockSpec((1, 1, W, Cin),
                         lambda b, s: (b, jnp.maximum(s * TH - 1, 0), 0, 0)),
            pl.BlockSpec((1, 1, W, Cin),
                         lambda b, s: (b, jnp.minimum(s * TH + TH, H - 1), 0, 0)),
            # Fused weights: whole array, constant index map (VMEM resident).
            pl.BlockSpec((16 * Cin, 4 * Cout), lambda b, s: (0, 0)),
        ],
        out_specs=pl.BlockSpec((1, TH // 2, Wo, 4 * Cout),
                               lambda b, s: (b, s, 0, 0)),
    )

    y = pl.pallas_call(
        _downsample_kernel,
        out_shape=jax.ShapeDtypeStruct((B, Ho, Wo, 4 * Cout), x_nchw.dtype),
        grid_spec=grid_spec,
        compiler_params=pltpu.CompilerParams(
            dimension_semantics=("parallel", "parallel"),
            vmem_limit_bytes=vmem_limit),
    )(x_nhwc, x_nhwc, x_nhwc, w_mat)

    # (B, Ho, Wo, (py*2+px)*Cout + c) -> NCHW with torch channel order c*4 + off.
    y = y.reshape(B, Ho, Wo, 4, Cout)
    y = jnp.transpose(y, (0, 4, 3, 1, 2))
    return y.reshape(B, 4 * Cout, Ho, Wo)


def pixel_unshuffle_nchw(x, r=2):
    """torch.nn.PixelUnshuffle semantics on NCHW (reference check only)."""
    B, C, H, W = x.shape
    x = x.reshape(B, C, H // r, r, W // r, r)
    x = jnp.transpose(x, (0, 1, 3, 5, 2, 4))
    return x.reshape(B, C * r * r, H // r, W // r)


if __name__ == "__main__":
    key = jax.random.PRNGKey(0)
    kx, kw = jax.random.split(key)

    B, n_feat, H, W = 2, 4, 16, 16
    x = jax.random.normal(kx, (B, n_feat, H, W), dtype=jnp.float32)
    # Conv2d(n_feat, n_feat//2, 3, bias=False) weight: (Cout, Cin, 3, 3).
    w = 0.1 * jax.random.normal(kw, (n_feat // 2, n_feat, 3, 3),
                                dtype=jnp.float32)

    # Reference: XLA conv + PixelUnshuffle.
    ref_conv = jax.lax.conv_general_dilated(
        x, w, window_strides=(1, 1), padding="SAME",
        dimension_numbers=("NCHW", "OIHW", "NCHW"))
    ref = pixel_unshuffle_nchw(ref_conv, r=2)

    # Multi-strip path (exercises the in-kernel halo handling).
    out = jax.block_until_ready(downsample_forward(x, w, strip_rows=8))
    assert out.shape == (B, 2 * n_feat, H // 2, W // 2), out.shape
    assert jnp.allclose(out, ref, atol=1e-4, rtol=1e-4)

    # Single-strip path (halo rows fully masked) must agree as well.
    out1 = jax.block_until_ready(downsample_forward(x, w, strip_rows=16))
    assert jnp.allclose(out1, ref, atol=1e-4, rtol=1e-4)

    print("KERNEL_OK")
</pallas_src>

<mosaic_0001>
module attributes {stable_mosaic.version = 11 : i64} {
  func.func @_downsample_kernel(%arg0: i32, %arg1: i32, %arg2: memref<1x8x16x4xf32, #tpu.memory_space<vmem>>, %arg3: memref<1x1x16x4xf32, #tpu.memory_space<vmem>>, %arg4: memref<1x1x16x4xf32, #tpu.memory_space<vmem>>, %arg5: memref<64x8xf32, #tpu.memory_space<vmem>>, %arg6: memref<1x4x8x8xf32, #tpu.memory_space<vmem>>) attributes {dimension_semantics = [#tpu.dimension_semantics<parallel>, #tpu.dimension_semantics<parallel>], iteration_bounds = array<i64: 2, 2>, scalar_prefetch = 0 : i64, scratch_operands = 0 : i64, tpu.core_type = #tpu.core_type<tc>, window_params = [{transform_indices = @transform_0, window_bounds = array<i64: 1, 8, 16, 4>}, {transform_indices = @transform_1, window_bounds = array<i64: 1, 1, 16, 4>}, {transform_indices = @transform_2, window_bounds = array<i64: 1, 1, 16, 4>}, {pipeline_mode = #tpu.pipeline_mode<synchronous>, transform_indices = @transform_3, window_bounds = array<i64: 64, 8>}, {transform_indices = @transform_4, window_bounds = array<i64: 1, 4, 8, 8>}]} {
    %c0 = arith.constant 0 : index
    %c0_0 = arith.constant 0 : index
    %c0_1 = arith.constant 0 : index
    %c0_2 = arith.constant 0 : index
    %0 = vector.load %arg2[%c0, %c0_0, %c0_1, %c0_2] : memref<1x8x16x4xf32, #tpu.memory_space<vmem>>, vector<1x8x16x4xf32>
    %1 = vector.shape_cast %0 : vector<1x8x16x4xf32> to vector<8x16x4xf32>
    %cst = arith.constant 0.000000e+00 : f32
    %2 = vector.broadcast %cst : f32 to vector<1x16x4xf32>
    %c0_i32 = arith.constant 0 : i32
    %3 = arith.cmpi sgt, %arg1, %c0_i32 : i32
    %c0_3 = arith.constant 0 : index
    %c0_4 = arith.constant 0 : index
    %c0_5 = arith.constant 0 : index
    %c0_6 = arith.constant 0 : index
    %4 = vector.load %arg3[%c0_3, %c0_4, %c0_5, %c0_6] : memref<1x1x16x4xf32, #tpu.memory_space<vmem>>, vector<1x1x16x4xf32>
    %5 = vector.shape_cast %4 : vector<1x1x16x4xf32> to vector<1x16x4xf32>
    %6 = arith.select %3, %5, %2 : vector<1x16x4xf32>
    %c1_i32 = arith.constant 1 : i32
    %7 = arith.cmpi slt, %arg1, %c1_i32 : i32
    %c0_7 = arith.constant 0 : index
    %c0_8 = arith.constant 0 : index
    %c0_9 = arith.constant 0 : index
    %c0_10 = arith.constant 0 : index
    %8 = vector.load %arg4[%c0_7, %c0_8, %c0_9, %c0_10] : memref<1x1x16x4xf32, #tpu.memory_space<vmem>>, vector<1x1x16x4xf32>
    %9 = vector.shape_cast %8 : vector<1x1x16x4xf32> to vector<1x16x4xf32>
    %10 = arith.select %7, %9, %2 : vector<1x16x4xf32>
    %11 = tpu.concatenate %6, %1, %10 in 0 : vector<1x16x4xf32>, vector<8x16x4xf32>, vector<1x16x4xf32> -> vector<10x16x4xf32>
    %cst_11 = arith.constant 0.000000e+00 : f32
    %12 = vector.broadcast %cst_11 : f32 to vector<10x1x4xf32>
    %13 = tpu.concatenate %12, %11, %12 in 1 : vector<10x1x4xf32>, vector<10x16x4xf32>, vector<10x1x4xf32> -> vector<10x18x4xf32>
    %14 = vector.shape_cast %13 : vector<10x18x4xf32> to vector<5x2x9x2x4xf32>
    %15 = vector.extract_strided_slice %14 {offsets = [0, 0, 0, 0, 0], sizes = [5, 1, 9, 1, 4], strides = [1, 1, 1, 1, 1]} : vector<5x2x9x2x4xf32> to vector<5x1x9x1x4xf32>
    %16 = vector.shape_cast %15 : vector<5x1x9x1x4xf32> to vector<5x9x4xf32>
    %17 = vector.extract_strided_slice %14 {offsets = [0, 0, 0, 1, 0], sizes = [5, 1, 9, 1, 4], strides = [1, 1, 1, 1, 1]} : vector<5x2x9x2x4xf32> to vector<5x1x9x1x4xf32>
    %18 = vector.shape_cast %17 : vector<5x1x9x1x4xf32> to vector<5x9x4xf32>
    %19 = vector.extract_strided_slice %14 {offsets = [0, 1, 0, 0, 0], sizes = [5, 1, 9, 1, 4], strides = [1, 1, 1, 1, 1]} : vector<5x2x9x2x4xf32> to vector<5x1x9x1x4xf32>
    %20 = vector.shape_cast %19 : vector<5x1x9x1x4xf32> to vector<5x9x4xf32>
    %21 = vector.extract_strided_slice %14 {offsets = [0, 1, 0, 1, 0], sizes = [5, 1, 9, 1, 4], strides = [1, 1, 1, 1, 1]} : vector<5x2x9x2x4xf32> to vector<5x1x9x1x4xf32>
    %22 = vector.shape_cast %21 : vector<5x1x9x1x4xf32> to vector<5x9x4xf32>
    %23 = vector.extract_strided_slice %16 {offsets = [0, 0, 0], sizes = [4, 8, 4], strides = [1, 1, 1]} : vector<5x9x4xf32> to vector<4x8x4xf32>
    %24 = vector.extract_strided_slice %18 {offsets = [0, 0, 0], sizes = [4, 8, 4], strides = [1, 1, 1]} : vector<5x9x4xf32> to vector<4x8x4xf32>
    %25 = vector.extract_strided_slice %16 {offsets = [0, 1, 0], sizes = [4, 8, 4], strides = [1, 1, 1]} : vector<5x9x4xf32> to vector<4x8x4xf32>
    %26 = vector.extract_strided_slice %18 {offsets = [0, 1, 0], sizes = [4, 8, 4], strides = [1, 1, 1]} : vector<5x9x4xf32> to vector<4x8x4xf32>
    %27 = vector.extract_strided_slice %20 {offsets = [0, 0, 0], sizes = [4, 8, 4], strides = [1, 1, 1]} : vector<5x9x4xf32> to vector<4x8x4xf32>
    %28 = vector.extract_strided_slice %22 {offsets = [0, 0, 0], sizes = [4, 8, 4], strides = [1, 1, 1]} : vector<5x9x4xf32> to vector<4x8x4xf32>
    %29 = vector.extract_strided_slice %20 {offsets = [0, 1, 0], sizes = [4, 8, 4], strides = [1, 1, 1]} : vector<5x9x4xf32> to vector<4x8x4xf32>
    %30 = vector.extract_strided_slice %22 {offsets = [0, 1, 0], sizes = [4, 8, 4], strides = [1, 1, 1]} : vector<5x9x4xf32> to vector<4x8x4xf32>
    %31 = vector.extract_strided_slice %16 {offsets = [1, 0, 0], sizes = [4, 8, 4], strides = [1, 1, 1]} : vector<5x9x4xf32> to vector<4x8x4xf32>
    %32 = vector.extract_strided_slice %18 {offsets = [1, 0, 0], sizes = [4, 8, 4], strides = [1, 1, 1]} : vector<5x9x4xf32> to vector<4x8x4xf32>
    %33 = vector.extract_strided_slice %16 {offsets = [1, 1, 0], sizes = [4, 8, 4], strides = [1, 1, 1]} : vector<5x9x4xf32> to vector<4x8x4xf32>
    %34 = vector.extract_strided_slice %18 {offsets = [1, 1, 0], sizes = [4, 8, 4], strides = [1, 1, 1]} : vector<5x9x4xf32> to vector<4x8x4xf32>
    %35 = vector.extract_strided_slice %20 {offsets = [1, 0, 0], sizes = [4, 8, 4], strides = [1, 1, 1]} : vector<5x9x4xf32> to vector<4x8x4xf32>
    %36 = vector.extract_strided_slice %22 {offsets = [1, 0, 0], sizes = [4, 8, 4], strides = [1, 1, 1]} : vector<5x9x4xf32> to vector<4x8x4xf32>
    %37 = vector.extract_strided_slice %20 {offsets = [1, 1, 0], sizes = [4, 8, 4], strides = [1, 1, 1]} : vector<5x9x4xf32> to vector<4x8x4xf32>
    %38 = vector.extract_strided_slice %22 {offsets = [1, 1, 0], sizes = [4, 8, 4], strides = [1, 1, 1]} : vector<5x9x4xf32> to vector<4x8x4xf32>
    %39 = tpu.concatenate %23, %24, %25, %26, %27, %28, %29, %30, %31, %32, %33, %34, %35, %36, %37, %38 in 2 : vector<4x8x4xf32>, vector<4x8x4xf32>, vector<4x8x4xf32>, vector<4x8x4xf32>, vector<4x8x4xf32>, vector<4x8x4xf32>, vector<4x8x4xf32>, vector<4x8x4xf32>, vector<4x8x4xf32>, vector<4x8x4xf32>, vector<4x8x4xf32>, vector<4x8x4xf32>, vector<4x8x4xf32>, vector<4x8x4xf32>, vector<4x8x4xf32>, vector<4x8x4xf32> -> vector<4x8x64xf32>
    %40 = vector.shape_cast %39 : vector<4x8x64xf32> to vector<32x64xf32>
    %c0_12 = arith.constant 0 : index
    %c0_13 = arith.constant 0 : index
    %41 = vector.load %arg5[%c0_12, %c0_13] : memref<64x8xf32, #tpu.memory_space<vmem>>, vector<64x8xf32>
    %cst_14 = arith.constant dense<0.000000e+00> : vector<32x8xf32>
    %42 = tpu.matmul %40, %41, %cst_14 {dimension_numbers = #tpu.dot_dimension_numbers<[1], [0], [0], [1], [0, 0, 1, 1], [], []>} : vector<32x64xf32>, vector<64x8xf32>, vector<32x8xf32> -> vector<32x8xf32>
    %43 = vector.shape_cast %42 : vector<32x8xf32> to vector<1x4x8x8xf32>
    %c0_15 = arith.constant 0 : index
    %c0_16 = arith.constant 0 : index
    %c0_17 = arith.constant 0 : index
    %c0_18 = arith.constant 0 : index
    %44 = vector.load %arg6[%c0_15, %c0_16, %c0_17, %c0_18] : memref<1x4x8x8xf32, #tpu.memory_space<vmem>>, vector<1x4x8x8xf32>
    tpu.vector_store %arg6[%c0_15, %c0_16, %c0_17, %c0_18], %43 {strides = array<i32>} : memref<1x4x8x8xf32, #tpu.memory_space<vmem>>, vector<1x4x8x8xf32>,
    return
  }
  func.func @transform_0(%arg0: i32, %arg1: i32) -> (i32, i32, i32, i32) {
    %c0_i32 = arith.constant 0 : i32
    %c0_i32_0 = arith.constant 0 : i32
    %c0_i32_1 = arith.constant 0 : i32
    return %arg0, %arg1, %c0_i32, %c0_i32_0 : i32, i32, i32, i32
  }
  func.func @transform_1(%arg0: i32, %arg1: i32) -> (i32, i32, i32, i32) {
    %c8_i32 = arith.constant 8 : i32
    %0 = arith.muli %arg1, %c8_i32 : i32
    %c1_i32 = arith.constant 1 : i32
    %1 = arith.subi %0, %c1_i32 : i32
    %c0_i32 = arith.constant 0 : i32
    %2 = arith.maxsi %1, %c0_i32 : i32
    %c0_i32_0 = arith.constant 0 : i32
    %c0_i32_1 = arith.constant 0 : i32
    %c0_i32_2 = arith.constant 0 : i32
    return %arg0, %2, %c0_i32_0, %c0_i32_1 : i32, i32, i32, i32
  }
  func.func @transform_2(%arg0: i32, %arg1: i32) -> (i32, i32, i32, i32) {
    %c8_i32 = arith.constant 8 : i32
    %0 = arith.muli %arg1, %c8_i32 : i32
    %c8_i32_0 = arith.constant 8 : i32
    %1 = arith.addi %0, %c8_i32_0 : i32
    %c15_i32 = arith.constant 15 : i32
    %2 = arith.minsi %1, %c15_i32 : i32
    %c0_i32 = arith.constant 0 : i32
    %c0_i32_1 = arith.constant 0 : i32
    %c0_i32_2 = arith.constant 0 : i32
    return %arg0, %2, %c0_i32, %c0_i32_1 : i32, i32, i32, i32
  }
  func.func @transform_3(%arg0: i32, %arg1: i32) -> (i32, i32) {
    %c0_i32 = arith.constant 0 : i32
    %c0_i32_0 = arith.constant 0 : i32
    %c0_i32_1 = arith.constant 0 : i32
    return %c0_i32, %c0_i32_0 : i32, i32
  }
  func.func @transform_4(%arg0: i32, %arg1: i32) -> (i32, i32, i32, i32) {
    %c0_i32 = arith.constant 0 : i32
    %c0_i32_0 = arith.constant 0 : i32
    %c0_i32_1 = arith.constant 0 : i32
    return %arg0, %arg1, %c0_i32, %c0_i32_0 : i32, i32, i32, i32
  }
}

</mosaic_0001>

<bundles_post_ra>
// kernel: tpu_custom_call.1
= control target key start
LH: loop header
LB: loop body
LE: loop exit
PB: predicated region body
PF: predicated region fallthrough
CT: control target
= control target key end

     0   :  { %9 = vsyncpa [#allocation3], 0  ;;  %s4560_s0 = inlined_call_operand.vmem [shape: f32[2,16,16,4], index: 0, kind: input, shape index: {}]   ;;  %s4561_s1 = inlined_call_operand.vmem [shape: f32[2,16,16,4], index: 1, kind: input, shape index: {}]   ;;  %s4562_s2 = inlined_call_operand.vmem [shape: f32[2,16,16,4], index: 2, kind: input, shape index: {}]   ;;  %s4563_s3 = inlined_call_operand.vmem [shape: f32[64,8], index: 3, kind: input, shape index: {}]   ;;  %s4564_s4 = inlined_call_operand.hbm [shape: f32[2,8,8,8], index: 4, kind: output, shape index: {}]  }
   0x1   :  { %11 = vsyncpa [#allocation3 + $0x1], 0  ;;  %s2758_s15 = smov 0   ;;  %s2760_s16 = smov 0  }
   0x2   :  { %s2762_s17 = smov 0   ;;  %s2764_s18 = smov 0  }
   0x3   :  { %s2766_s19 = smov 0   ;;  %s2768_s20 = smov 0  }
   0x4   :  { %s2770_s21 = smov 0   ;;  %s2772_s22 = smov 0  }
   0x5 LB: > { %s2426_s23 = sadd.s32 4294967295, %s2713_s22   ;;  %s2427_s24 = sadd.s32 4294967294, %s2713_s22   ;;  %s2713_s22 = sphi %s2772_s22, %s17_s22   ;;  %s2709_s21 = sphi %s2770_s21, %s4840_s21   ;;  %s2705_s20 = sphi %s2768_s20, %s4839_s20   ;;  %s2701_s19 = sphi %s2766_s19, %s4838_s19   ;;  %s2697_s18 = sphi %s2764_s18, %s4837_s18   ;;  %s2693_s17 = sphi %s2762_s17, %s4836_s17   ;;  %s2689_s16 = sphi %s2760_s16, %s4835_s16   ;;  %s2685_s15 = sphi %s2758_s15, %s4834_s15  }
   0x6   : > { %s26_s25 = sadd.s32 1, %s2705_s20  ;;  %s29_s26 = sadd.s32 1, %s2709_s21 }
   0x7   : > { %p27_p0 = scmp.ge.s32.totalorder %s26_s25, 2  ;;  %p169_p1 = scmp.ne.s32.totalorder %s2693_s17, %s2689_s16 }
   0x8   : > { %p170_p2 = scmp.eq.s32.totalorder %s2426_s23, 3  ;;  %p175_p5 = scmp.ne.s32.totalorder %s2689_s16, %s2685_s15 }
   0x9   : > { %s4842_s25 = smov (%p27_p0, %s26_s25), 0  ;;  %s4844_s26 = smov (!%p27_p0, %s29_s26), %s2709_s21 }
   0xa   : > { %s155_s27 = ssub.s32 %s2705_s20, %s4842_s25  ;;  %p2809_p3 = por %p170_p2, %p169_p1 }
   0xb   : > { %p31_p4 = scmp.ge.s32.totalorder %s4844_s26, 2  ;;  %p176_p6 = scmp.eq.s32.totalorder %s2427_s24, 3 }
   0xc   : > { %p2436_p7 = scmp.ge.s32.totalorder %s2713_s22, 1  ;;  %p251_p9 = scmp.lt.s32.totalorder %s2713_s22, 5 }
   0xd   : > { %s4846_s26 = smov (%p31_p4, %s4844_s26), 0  ;;  %p2818_p8 = por %p176_p6, %p175_p5 }
   0xe   : > { %s154_s30 = ssub.s32 %s2709_s21, %s4846_s26  ;;  %s159_s5 = sadd.s32 1, %s2693_s17 }
   0xf   : > { %s156_s6 = sor.u32 %s155_s27, %s154_s30  ;;  %p252_p10 = pnand %p2436_p7, %p251_p9 }
  0x10   : > { %p157_p11 = scmp.eq.s32.totalorder %s156_s6, 0 }
  0x11   : > { %255 = sbr.rel (%p252_p10) target bundleno = 555 (0x22b), region = 36 }
  0x12   : > { %s2827_s7 = scalar_select %p157_p11, %s2693_s17, %s159_s5  }
  0x16   : > { %s2830_s8 = sshll.u32 %s2697_s18, 3  ;;  %p309_p12 = scmp.lt.s32.totalorder %s2701_s19, 1  ;;  %v2715_v0 = vmov 1983009808   ;;  %v501_v2 = vlaneseq  ;;  %vm406_vm0 = vcmask 1040384   ;;  %vm1035_vm1 = vcmask 1041409  }
  0x17   : > { %p311_p13 = scmp.lt.s32.totalorder %s2830_s8, 15  ;;  %v499_v1 = vunpack.c.l.s4 %v2715_v0  ;;  %vm1037_vm2 = vcmask 1042434   ;;  %vm1039_vm3 = vcmask 1043459   ;;  %vm1041_vm4 = vcmask 1044484   ;;  %s337_s30 = sadd.s32 8, %s2830_s8 }
  0x18   : > { %s310_s9 = scalar_select %p309_p12, %s2701_s19, 1  ;;  %v502_v4 = vshrl.u32 %v501_v2, 7  ;;  %vm1043_vm5 = vcmask 1045509   ;;  %vm1045_vm6 = vcmask 1046534   ;;  %vm1047_vm7 = vcmask 1047559  }
  0x19   : > { %s312_s10 = scalar_select %p311_p13, %s2830_s8, 15  ;;  %v500_v3 = vunpack.c.0.s8 %v499_v1  ;;  %vm2098_vm8 = vcmask 31744   ;;  %vm2103_vm9 = vcmask 64512   ;;  %vm2108_vm10 = vcmask 97280  }
  0x1a   : > { %s2836_s11 = sshll.u32 %s310_s9, 5  ;;  %v2850_v8 = vsub.s32 0, %v502_v4  ;;  %v2861_v16 = vsub.s32 1, %v502_v4  ;;  %p3017_p0 = scmp.lt.s32.totalorder %s337_s30, 15  ;;  %vm2113_vm11 = vcmask 130048   ;;  %vm2118_vm12 = vcmask 162816  }
  0x1b   : > { %s2439_s12 = sshll.u32 %s312_s10, 1  ;;  %v2848_v7 = vsub.s32 %v500_v3, %v502_v4  ;;  %s2716_s6 = smov 4   ;;  %vm2123_vm13 = vcmask 195584   ;;  %vm2128_vm14 = vcmask 228352   ;;  %vm2133_vm15 = vcmask 261120  }
  0x1c   : > { %s315_s13 = sadd.s32 %s2836_s11, %s2439_s12  ;;  %s4848_s30 = smov (!%p3017_p0, %s337_s30), 15 }
  0x1d   : > { %s2441_s14 = sshll.u32 %s315_s13, 3  ;;  %s4850_s30 = smov (!%p3017_p0, %s4848_s30), 15 }
  0x1e   : > { %s2842_s27 = scalar_lea.vmem %s4560_s0, %s2441_s14  ;;  %s3109_s9 = sshll.u32 %s4850_s30, 1 }
  0x1f   : > { %v360_v5 = vld [vmem:[%s2842_s27 + $0x30] sm:$0xff]  ;;  %v2846_v6 = vld [vmem:[%s2842_s27 + $0x38] sm:$0xff]  ;;  %v2866_v20 = vld [vmem:[%s2842_s27] sm:$0xff]  ;;  %s346_s10 = sadd.s32 %s3109_s9, %s2836_s11  ;;  %s3196_s12 = sadd.s32 4294967295, %s2830_s8 }
  0x20   : > { %v356_v9 = vld [vmem:[%s2842_s27 + $0x10] sm:$0xff]  ;;  %v419_v10 = vrot.slane %v360_v5, 7  ;;  %v4567_v11 = vrot.slane %v2846_v6, 7  ;;  %v2855_v12 = vld [vmem:[%s2842_s27 + $0x18] sm:$0xff]  ;;  %v410_v24 = vrot.slane %v2866_v20, 7  ;;  %v3006_v5 = vld [vmem:[%s2842_s27 + $0x8] sm:$0xff] }
  0x21   : > { %v413_v13 = vrot.slane %v356_v9, 7  ;;  %v364_v14 = vld [vmem:[%s2842_s27 + $0x50] sm:$0xff]  ;;  %v2859_v15 = vld [vmem:[%s2842_s27 + $0x58] sm:$0xff]  ;;  %v4566_v17 = vrot.slane %v2855_v12, 7  ;;  %4658 = vst [vmem:[#allocation7_spill] sm:$0xff] %v3006_v5  ;;  %p321_p1 = scmp.gt.s32.totalorder %s3196_s12, 0 }
  0x22   : > { %v425_v18 = vrot.slane %v364_v14, 7  ;;  %v4565_v19 = vrot.slane %v2859_v15, 7  ;;  %v421_v21 = vsel %vm406_vm0, %v419_v10, %v4567_v11  ;;  %v461_v22 = vsel %vm406_vm0, 0.0, %v419_v10  ;;  %p2444_p2 = scmp.lt.s32.totalorder %s3196_s12, 15  ;;  %s2717_s13 = smov 16  }
  0x23   : > { %v459_v23 = vsel %vm406_vm0, 0.0, %v413_v13  ;;  %v661_v25 = vcombine.high %v461_v22, %v461_v22  ;;  %v2875_v26 = vrot.slane %v461_v22, %v2848_v7  ;;  %v678_v27 = vcombine.high %v421_v21, %v421_v21  ;;  %s322_s8 = scalar_select %p321_p1, %s3196_s12, 0 }
  0x24   : > { %v2878_v28 = vrot.slane %v421_v21, %v2848_v7  ;;  %v415_v29 = vsel %vm406_vm0, %v413_v13, %v4566_v17  ;;  %v579_v30 = vcombine.high %v459_v23, %v459_v23  ;;  %v2884_v31 = vrot.slane %v459_v23, %v2848_v7  ;;  %p370_p4 = scmp.gt.s32.totalorder %s2697_s18, 0  ;;  %p378_p5 = scmp.lt.s32.totalorder %s2697_s18, 1 }
  0x25   : > { %4656 = vst [vmem:[#allocation5_spill] sm:$0xff] %v2875_v26  ;;  %v427_v32 = vsel %vm406_vm0, %v425_v18, %v4565_v19  ;;  %v2890_v33 = vrot.slane %v661_v25, %v2848_v7  ;;  %v2894_v34 = vcombine.high %v2875_v26, %v2875_v26  ;;  %v2897_v35 = vrot.slane %v678_v27, %v2848_v7  ;;  %s4852_s8 = smov (!%p2444_p2, %s322_s8), 15  ;;  %s2458_s30 = sshll.u32 %s346_s10, 3 }
  0x26   : > { %4657 = vst [vmem:[#allocation6_spill] sm:$0xff] %v2884_v31  ;;  %v2901_v36 = vcombine.high %v2878_v28, %v2878_v28  ;;  %v1141_v37 = vrot.slane %v2875_v26, %v2861_v16  ;;  %v2907_v38 = vrot.slane %v2878_v28, %v2861_v16  ;;  %v2910_v39 = vrot.slane %v579_v30, %v2848_v7  ;;  %s2449_s14 = sshll.u32 %s4852_s8, 1  ;;  %s2718_s8 = smov 8  }
  0x27   : > { %v2914_v40 = vcombine.high %v2884_v31, %v2884_v31  ;;  %v2918_v41 = vcombine.high %v2890_v33, %v2890_v33  ;;  %v2922_v42 = vcombine.high %v2897_v35, %v2897_v35  ;;  %v2926_v43 = vrot.slane %v2894_v34, %v2861_v16  ;;  %s329_s23 = sadd.s32 %s2449_s14, %s2836_s11  ;;  %s348_s5 = scalar_lea.vmem %s4562_s2, %s2458_s30 }
  0x28   : > { %v2930_v44 = vrot.slane %v2890_v33, %v2861_v16  ;;  %v2934_v45 = vrot.slane %v2901_v36, %v2861_v16  ;;  %v2938_v46 = vrot.slane %v2897_v35, %v2861_v16  ;;  %v2942_v47 = vcombine.high %v2910_v39, %v2910_v39  ;;  %s2451_s24 = sshll.u32 %s329_s23, 3  ;;  %s2719_s23 = smov 12  }
  0x29   : > { %v596_v48 = vcombine.high %v415_v29, %v415_v29  ;;  %v2946_v49 = vrot.slane %v2918_v41, %v2861_v16  ;;  %v2950_v50 = vrot.slane %v2922_v42, %v2861_v16  ;;  %v1216_v51 = vsel %vm1035_vm1, %v2926_v43, %v1141_v37  ;;  %s3498_s12 = scalar_lea.vmem %s4561_s1, %s2451_s24  ;;  %s2722_s24 = smov 28  }
  0x2a   : > { %v2955_v52 = vrot.slane %v415_v29, %v2848_v7  ;;  %v1217_v53 = vsel %vm1037_vm2, %v2930_v44, %v1216_v51  ;;  %v1109_v55 = vrot.slane %v2884_v31, %v2861_v16  ;;  %v2966_v56 = vrot.slane %v2914_v40, %v2861_v16  ;;  %s2610_s14 = scalar_select %p370_p4, 255, 0 }
  0x2b   : > { %v2960_v54 = vrot.slane %v596_v48, %v2848_v7  ;;  %v1218_v57 = vsel %vm1039_vm3, %v2946_v49, %v1217_v53  ;;  %v2976_v59 = vrot.slane %v2910_v39, %v2861_v16  ;;  %v2980_v60 = vrot.slane %v2942_v47, %v2861_v16  ;;  %s2616_s11 = scalar_select %p378_p5, 255, 0 }
  0x2c   : > { %v2972_v58 = vcombine.high %v2955_v52, %v2955_v52  ;;  %v1219_v61 = vsel %vm1041_vm4, %v2907_v38, %v1218_v57  ;;  %v2990_v63 = vrot.slane %v2955_v52, %v2861_v16  ;;  %v1209_v3 = vsel %vm1035_vm1, %v2966_v56, %v1109_v55  ;;  %s2729_s30 = smov 56   ;;  %s2730_s10 = smov 60  }
  0x2d   : > { %v2986_v62 = vcombine.high %v2960_v54, %v2960_v54  ;;  %v2994_v0 = vrot.slane %v2960_v54, %v2861_v16  ;;  %v1220_v1 = vsel %vm1043_vm5, %v2934_v45, %v1219_v61  ;;  %v463_v4 = vsel %vm406_vm0, 0.0, %v425_v18 }
  0x2e   : > { %v3000_v2 = vrot.slane %v2972_v58, %v2861_v16  ;;  %v1221_v9 = vsel %vm1045_vm6, %v2938_v46, %v1220_v1  ;;  %v1210_v13 = vsel %vm1037_vm2, %v2976_v59, %v1209_v3  ;;  %v743_v14 = vcombine.high %v463_v4, %v463_v4 }
  0x2f   : > { %v3013_v10 = vrot.slane %v2986_v62, %v2861_v16  ;;  %v3023_v18 = vsel %vm1047_vm7, %v2950_v50, %v1221_v9  ;;  %v1211_v21 = vsel %vm1039_vm3, %v2980_v60, %v1210_v13  ;;  %v3028_v22 = vrot.slane %v463_v4, %v2848_v7 }
  0x30   : > { %4660 = vst [vmem:[#allocation8_spill] sm:$0xff] %v3023_v18  ;;  %v760_v23 = vcombine.high %v427_v32, %v427_v32  ;;  %1234 = vrot.lane.b32.xlu0 %v3023_v18, %s2716_s6  ;;  %v1212_v25 = vsel %vm1041_vm4, %v2990_v63, %v1211_v21  ;;  %v3035_v27 = vrot.slane %v743_v14, %v2848_v7  ;;  %v4568_v30 = vrot.slane %v3006_v5, 7 }
  0x31   : > { %4661 = vst [vmem:[#allocation9_spill] sm:$0xff] %v3028_v22  ;;  %v3038_v29 = vrot.slane %v427_v32, %v2848_v7  ;;  %v1213_v37 = vsel %vm1043_vm5, %v3000_v2, %v1212_v25  ;;  %v3047_v48 = vcombine.high %v3028_v22, %v3028_v22  ;;  %v1173_v53 = vrot.slane %v3028_v22, %v2861_v16  ;;  %v362_v25 = vld [vmem:[%s2842_s27 + $0x40] sm:$0xff] }
  0x32   : > { %v3050_v51 = vrot.slane %v760_v23, %v2848_v7  ;;  %v1214_v32 = vsel %vm1045_vm6, %v2994_v0, %v1213_v37  ;;  %v3058_v55 = vcombine.high %v3035_v27, %v3035_v27  ;;  %v3066_v61 = vrot.slane %v3035_v27, %v2861_v16  ;;  %v3107_v37 = vld [vmem:[%s2842_s27 + $0x48] sm:$0xff] }
  0x33   : > { %v3062_v57 = vcombine.high %v3038_v29, %v3038_v29  ;;  %v3072_v1 = vsel %vm1047_vm7, %v3013_v10, %v1214_v32  ;;  %v3080_v4 = vrot.slane %v3047_v48, %v2861_v16  ;;  %v3084_v9 = vrot.slane %v3038_v29, %v2861_v16  ;;  %4668 = vst [vmem:[#allocation16_spill] sm:$0xff] %v3107_v37 }
  0x34   : > { %4662 = vst [vmem:[#allocation10_spill] sm:$0xff] %v3066_v61  ;;  %4663 = vst [vmem:[#allocation11_spill] sm:$0xff] %v3072_v1  ;;  %v3076_v3 = vcombine.high %v3050_v51, %v3050_v51  ;;  %1232 = vrot.lane.b32.xlu1 %v3072_v1, %s2716_s6  ;;  %v3090_v13 = vrot.slane %v3058_v55, %v2861_v16  ;;  %v3098_v21 = vrot.slane %v3050_v51, %v2861_v16 }
  0x35   : > { %4664 = vst [vmem:[#allocation12_spill] sm:$0xff] %v3084_v9  ;;  %v3094_v14 = vrot.slane %v3062_v57, %v2861_v16  ;;  %v412_v23 = vsel %vm406_vm0, %v410_v24, %v4568_v30  ;;  %v1223_v19 = vsel %vm1035_vm1, %v3080_v4, %v1173_v53  ;;  %v458_v17 = vsel %vm406_vm0, 0.0, %v410_v24 }
  0x36   : > { %4665 = vst [vmem:[#allocation13_spill] sm:$0xff] %v3090_v13  ;;  %4667 = vst [vmem:[#allocation15_spill] sm:$0xff] %v3098_v21  ;;  %v3113_v32 = vrot.slane %v3076_v3, %v2861_v16  ;;  %v555_v11 = vcombine.high %v412_v23, %v412_v23  ;;  %v1224_v30 = vsel %vm1037_vm2, %v3066_v61, %v1223_v19  ;;  %v422_v20 = vrot.slane %v362_v25, 7 }
  0x37   : > { %4666 = vst [vmem:[#allocation14_spill] sm:$0xff] %v3094_v14  ;;  %v538_v18 = vcombine.high %v458_v17, %v458_v17  ;;  %v3125_v1 = vrot.slane %v458_v17, %v2848_v7  ;;  %v3128_v26 = vrot.slane %v412_v23, %v2848_v7  ;;  %v1225_v31 = vsel %vm1039_vm3, %v3090_v13, %v1224_v30 }
  0x38   : > { %4669 = vst [vmem:[#allocation17_spill] sm:$0xff] %v3113_v32  ;;  %v3133_v53 = vrot.slane %v555_v11, %v2848_v7  ;;  %v1226_v22 = vsel %vm1041_vm4, %v3084_v9, %v1225_v31 }
  0x39   : > { %4670 = vst [vmem:[#allocation18_spill] sm:$0xff] %v3125_v1  ;;  %4671 = vst [vmem:[#allocation19_spill] sm:$0xff] %v3128_v26  ;;  %v3139_v19 = vrot.slane %v538_v18, %v2848_v7  ;;  %v3143_v17 = vcombine.high %v3125_v1, %v3125_v1  ;;  %v3147_v11 = vcombine.high %v3128_v26, %v3128_v26 }
  0x3a   : > { %4672 = vst [vmem:[#allocation20_spill] sm:$0xff] %v3133_v53  ;;  %v1227_v30 = vsel %vm1043_vm5, %v3094_v14, %v1226_v22  ;;  %v3153_v31 = vcombine.high %v3133_v53, %v3133_v53  ;;  %v1357_v18 = vrot.slane %v3125_v1, %v2850_v8  ;;  %v3159_v23 = vrot.slane %v3128_v26, %v2850_v8  ;;  %v3193_v14 = vld [vmem:[%s2842_s27 + $0x28] sm:$0xff] }
  0x3b   : > { %4673 = vst [vmem:[#allocation21_spill] sm:$0xff] %v3139_v19  ;;  %4674 = vst [vmem:[#allocation22_spill] sm:$0xff] %v3143_v17  ;;  %v1228_v25 = vsel %vm1045_vm6, %v3098_v21, %v1227_v30  ;;  %v3165_v24 = vcombine.high %v3139_v19, %v3139_v19  ;;  %v3169_v22 = vrot.slane %v3143_v17, %v2850_v8  ;;  %v358_v21 = vld [vmem:[%s2842_s27 + $0x20] sm:$0xff] }
  0x3c   : > { %4675 = vst [vmem:[#allocation23_spill] sm:$0xff] %v3147_v11  ;;  %4676 = vst [vmem:[#allocation24_spill] sm:$0xff] %v3153_v31  ;;  %v3173_v5 = vrot.slane %v3139_v19, %v2850_v8  ;;  %v3177_v1 = vsel %vm1047_vm7, %v3113_v32, %v1228_v25  ;;  %v3181_v26 = vrot.slane %v3147_v11, %v2850_v8  ;;  %v4687_v11 = vrot.slane %v3107_v37, 7 }
  0x3d   : > { %4677 = vst [vmem:[#allocation25_spill] sm:$0xff] %v3159_v23  ;;  %4678 = vst [vmem:[#allocation26_spill] sm:$0xff] %v3165_v24  ;;  %v3185_v30 = vrot.slane %v3133_v53, %v2850_v8  ;;  %v3189_v17 = vrot.slane %v3153_v31, %v2850_v8  ;;  %1236 = vrot.lane.b32.xlu1 %v3177_v1, %s2716_s6  ;;  %v3202_v25 = vrot.slane %v3165_v24, %v2850_v8 }
  0x3e   : > { %4679 = vst [vmem:[#allocation27_spill] sm:$0xff] %v3169_v22  ;;  %4680 = vst [vmem:[#allocation28_spill] sm:$0xff] %v3173_v5  ;;  %v1482_v53 = vsel %vm1035_vm1, %v3169_v22, %v1357_v18  ;;  %v424_v31 = vsel %vm406_vm0, %v422_v20, %v4687_v11  ;;  %v462_v19 = vsel %vm406_vm0, 0.0, %v422_v20  ;;  %v416_v18 = vrot.slane %v358_v21, 7 }
  0x3f   : > { %4681 = vst [vmem:[#allocation29_spill] sm:$0xff] %v3177_v1  ;;  %4682 = vst [vmem:[#allocation30_spill] sm:$0xff] %v3181_v26  ;;  %v1483_v32 = vsel %vm1037_vm2, %v3173_v5, %v1482_v53  ;;  %v702_v9 = vcombine.high %v462_v19, %v462_v19  ;;  %v3213_v13 = vrot.slane %v462_v19, %v2848_v7  ;;  %v4700_v22 = vrot.slane %v3193_v14, 7 }
  0x40   : > { %4683 = vst [vmem:[#allocation31_spill] sm:$0xff] %v3185_v30  ;;  %4684 = vst [vmem:[#allocation32_spill] sm:$0xff] %v3189_v17  ;;  %v719_v1 = vcombine.high %v424_v31, %v424_v31  ;;  %v1484_v24 = vsel %vm1039_vm3, %v3202_v25, %v1483_v32  ;;  %v3218_v61 = vrot.slane %v424_v31, %v2848_v7 }
  0x41   : > { %4685 = vst [vmem:[#allocation33_spill] sm:$0xff] %v3193_v14  ;;  %4686 = vst [vmem:[#allocation34_spill] sm:$0xff] %v3202_v25  ;;  %v1485_v20 = vsel %vm1041_vm4, %v3159_v23, %v1484_v24  ;;  %v3225_v53 = vrot.slane %v702_v9, %v2848_v7  ;;  %v3229_v19 = vcombine.high %v3213_v13, %v3213_v13  ;;  %v4701_v14 = vrot.slane %v2846_v6, 7 }
  0x42   : > { %4688 = vst [vmem:[#allocation35_spill] sm:$0xff] %v3218_v61  ;;  %v3232_v32 = vrot.slane %v719_v1, %v2848_v7  ;;  %v1486_v21 = vsel %vm1043_vm5, %v3181_v26, %v1485_v20  ;;  %v3238_v31 = vcombine.high %v3218_v61, %v3218_v61  ;;  %v1421_v9 = vrot.slane %v3213_v13, %v2850_v8 }
  0x43   : > { %v3244_v24 = vrot.slane %v3218_v61, %v2850_v8  ;;  %v1487_v11 = vsel %vm1045_vm6, %v3185_v30, %v1486_v21  ;;  %v3250_v1 = vcombine.high %v3225_v53, %v3225_v53  ;;  %v3258_v26 = vrot.slane %v3229_v19, %v2850_v8 }
  0x44   : > { %4689 = vst [vmem:[#allocation36_spill] sm:$0xff] %v3232_v32  ;;  %4690 = vst [vmem:[#allocation37_spill] sm:$0xff] %v3238_v31  ;;  %v3254_v20 = vcombine.high %v3232_v32, %v3232_v32  ;;  %v1488_v23 = vsel %vm1047_vm7, %v3189_v17, %v1487_v11  ;;  %v3265_v25 = vrot.slane %v3225_v53, %v2850_v8 }
  0x45   : > { %4691 = vst [vmem:[#allocation38_spill] sm:$0xff] %v3244_v24  ;;  %4692 = vst [vmem:[#allocation39_spill] sm:$0xff] %v3250_v1  ;;  %v3269_v21 = vrot.slane %v3238_v31, %v2850_v8  ;;  %v3273_v30 = vrot.slane %v3232_v32, %v2850_v8  ;;  %1510 = vrot.lane.b32.xlu0 %v1488_v23, %s2717_s13  ;;  %v3281_v11 = vrot.slane %v3250_v1, %v2850_v8 }
  0x46   : > { %4693 = vst [vmem:[#allocation40_spill] sm:$0xff] %v3254_v20  ;;  %4694 = vst [vmem:[#allocation41_spill] sm:$0xff] %v3258_v26  ;;  %v3285_v17 = vrot.slane %v3254_v20, %v2850_v8  ;;  %v1496_v5 = vsel %vm1035_vm1, %v3258_v26, %v1421_v9  ;;  %v418_v37 = vsel %vm406_vm0, %v416_v18, %v4700_v22  ;;  %v460_v23 = vsel %vm406_vm0, 0.0, %v416_v18 }
  0x47   : > { %4695 = vst [vmem:[#allocation42_spill] sm:$0xff] %v3265_v25  ;;  %4696 = vst [vmem:[#allocation43_spill] sm:$0xff] %v3269_v21  ;;  %v1497_v32 = vsel %vm1037_vm2, %v3265_v25, %v1496_v5  ;;  %v637_v31 = vcombine.high %v418_v37, %v418_v37  ;;  %v3296_v61 = vrot.slane %v418_v37, %v2848_v7  ;;  %v471_v22 = vsel %vm406_vm0, %v4701_v14, 0.0 }
  0x48   : > { %4697 = vst [vmem:[#allocation44_spill] sm:$0xff] %v3273_v30  ;;  %4698 = vst [vmem:[#allocation45_spill] sm:$0xff] %v3281_v11  ;;  %v1498_v20 = vsel %vm1039_vm3, %v3281_v11, %v1497_v32  ;;  %v620_v1 = vcombine.high %v460_v23, %v460_v23  ;;  %v3301_v9 = vrot.slane %v460_v23, %v2848_v7 }
  0x49   : > { %4699 = vst [vmem:[#allocation46_spill] sm:$0xff] %v3285_v17  ;;  %v1499_v5 = vsel %vm1041_vm4, %v3244_v24, %v1498_v20  ;;  %v3309_v18 = vrot.slane %v637_v31, %v2848_v7  ;;  %v3313_v37 = vcombine.high %v3296_v61, %v3296_v61  ;;  %v3317_v32 = vrot.slane %v3296_v61, %v2850_v8 }
  0x4a   : > { %v1500_v6 = vsel %vm1043_vm5, %v3269_v21, %v1499_v5  ;;  %v3326_v14 = vrot.slane %v620_v1, %v2848_v7  ;;  %v3330_v31 = vcombine.high %v3301_v9, %v3301_v9  ;;  %v1389_v20 = vrot.slane %v3301_v9, %v2850_v8 }
  0x4b   : > { %4702 = vst [vmem:[#allocation47_spill] sm:$0xff] %v3309_v18  ;;  %4703 = vst [vmem:[#allocation48_spill] sm:$0xff] %v3313_v37  ;;  %v1501_v23 = vsel %vm1045_vm6, %v3273_v30, %v1500_v6  ;;  %v3338_v24 = vcombine.high %v3309_v18, %v3309_v18  ;;  %v3342_v5 = vrot.slane %v3313_v37, %v2850_v8 }
  0x4c   : > { %v3346_v1 = vrot.slane %v3309_v18, %v2850_v8  ;;  %v3351_v21 = vsel %vm1047_vm7, %v3285_v17, %v1501_v23  ;;  %v3355_v6 = vcombine.high %v3326_v14, %v3326_v14  ;;  %v3359_v30 = vrot.slane %v3330_v31, %v2850_v8 }
  0x4d   : > { %4704 = vst [vmem:[#allocation49_spill] sm:$0xff] %v3338_v24  ;;  %4705 = vst [vmem:[#allocation50_spill] sm:$0xff] %v3351_v21  ;;  %v3363_v11 = vrot.slane %v3326_v14, %v2850_v8  ;;  %1514 = vrot.lane.b32.xlu1 %v3351_v21, %s2717_s13  ;;  %v3369_v25 = vrot.slane %v3338_v24, %v2850_v8  ;;  %v3372_v23 = vrot.slane %v471_v22, %v2848_v7 }
  0x4e   : > { %v3376_v17 = vrot.slane %v2894_v34, %v2850_v8  ;;  %v3380_v26 = vrot.slane %v2890_v33, %v2850_v8  ;;  %v3385_v21 = vrot.slane %v3355_v6, %v2850_v8  ;;  %v1489_v24 = vsel %vm1035_vm1, %v3359_v30, %v1389_v20 }
  0x4f   : > { %4706 = vst [vmem:[#allocation51_spill] sm:$0xff] %v3363_v11  ;;  %v3391_v22 = vrot.slane %v2918_v41, %v2850_v8  ;;  %v3395_v34 = vrot.slane %v2878_v28, %v2850_v8  ;;  %v1490_v33 = vsel %vm1037_vm2, %v3363_v11, %v1489_v24  ;;  %v3401_v18 = vrot.slane %v2901_v36, %v2850_v8 }
  0x50   : > { %4707 = vst [vmem:[#allocation52_spill] sm:$0xff] %v3376_v17  ;;  %4708 = vst [vmem:[#allocation53_spill] sm:$0xff] %v3380_v26  ;;  %v3405_v37 = vrot.slane %v2897_v35, %v2850_v8  ;;  %v3409_v20 = vrot.slane %v2922_v42, %v2850_v8  ;;  %v1491_v41 = vsel %vm1039_vm3, %v3385_v21, %v1490_v33  ;;  %v4715_v36 = vrot.slane %v2855_v12, 7 }
  0x51   : > { %4709 = vst [vmem:[#allocation54_spill] sm:$0xff] %v3385_v21  ;;  %4710 = vst [vmem:[#allocation55_spill] sm:$0xff] %v3391_v22  ;;  %v1253_v28 = vrot.slane %v3372_v23, %v2850_v8  ;;  %v1272_v24 = vsel %vm1035_vm1, %v3380_v26, %v3376_v17  ;;  %v1492_v35 = vsel %vm1041_vm4, %v3317_v32, %v1491_v41 }
  0x52   : > { %4711 = vst [vmem:[#allocation56_spill] sm:$0xff] %v3395_v34  ;;  %4712 = vst [vmem:[#allocation57_spill] sm:$0xff] %v3401_v18  ;;  %v469_v11 = vsel %vm406_vm0, %v4715_v36, 0.0  ;;  %v1273_v42 = vsel %vm1037_vm2, %v3391_v22, %v1272_v24  ;;  %v3431_v21 = vrot.slane %v2914_v40, %v2850_v8  ;;  %v1493_v26 = vsel %vm1043_vm5, %v3342_v5, %v1492_v35 }
  0x53   : > { %4713 = vst [vmem:[#allocation58_spill] sm:$0xff] %v3405_v37  ;;  %4714 = vst [vmem:[#allocation59_spill] sm:$0xff] %v3409_v20  ;;  %v3427_v33 = vrot.slane %v469_v11, %v2848_v7  ;;  %v1274_v12 = vsel %vm1039_vm3, %v3395_v34, %v1273_v42  ;;  %v3439_v36 = vrot.slane %v2910_v39, %v2850_v8 }
  0x54   : > { %v3443_v41 = vrot.slane %v2942_v47, %v2850_v8  ;;  %v1494_v11 = vsel %vm1045_vm6, %v3346_v1, %v1493_v26  ;;  %v1275_v40 = vsel %vm1041_vm4, %v3401_v18, %v1274_v12  ;;  %v3451_v24 = vrot.slane %v2955_v52, %v2850_v8 }
  0x55   : > { %4716 = vst [vmem:[#allocation60_spill] sm:$0xff] %v3439_v36  ;;  %v3455_v35 = vrot.slane %v2972_v58, %v2850_v8  ;;  %v3459_v39 = vsel %vm1047_vm7, %v3369_v25, %v1494_v11  ;;  %v1276_v47 = vsel %vm1043_vm5, %v3405_v37, %v1275_v40  ;;  %v3465_v26 = vrot.slane %v2960_v54, %v2850_v8  ;;  %v4755_v37 = vld [vmem:[#allocation22_spill] sm:$0xff] }
  0x56   : > { %4717 = vst [vmem:[#allocation61_spill] sm:$0xff] %v3443_v41  ;;  %4718 = vst [vmem:[#allocation62_spill] sm:$0xff] %v3451_v24  ;;  %v3469_v52 = vrot.slane %v2986_v62, %v2850_v8  ;;  %1512 = vrot.lane.b32.xlu0 %v3459_v39, %s2717_s13  ;;  %v1277_v58 = vsel %vm1045_vm6, %v3409_v20, %v1276_v47  ;;  %v1249_v42 = vrot.slane %v3427_v33, %v2850_v8 }
  0x57   : > { %4719 = vst [vmem:[#allocation63_spill] sm:$0xff] %v3455_v35  ;;  %4720 = vst [vmem:[#allocation64_spill] sm:$0xff] %v3459_v39  ;;  %v1265_v12 = vsel %vm1035_vm1, %v3439_v36, %v3431_v21  ;;  %v4723_v54 = vrot.slane %v2859_v15, 7  ;;  %v3484_v62 = vsel %vm1047_vm7, %v1253_v28, %v1277_v58  ;;  %v3493_v47 = vrot.slane %v3047_v48, %v2850_v8 }
  0x58   : > { %4721 = vst [vmem:[#allocation65_spill] sm:$0xff] %v3465_v26  ;;  %4722 = vst [vmem:[#allocation66_spill] sm:$0xff] %v3469_v52  ;;  %v1266_v40 = vsel %vm1037_vm2, %v3443_v41, %v1265_v12  ;;  %1290 = vrot.lane.b32.xlu1 %v3484_v62, %s2718_s8  ;;  %v3506_v28 = vrot.slane %v3035_v27, %v2850_v8  ;;  %v3510_v48 = vrot.slane %v3058_v55, %v2850_v8 }
  0x59   : > { %v473_v11 = vsel %vm406_vm0, %v4723_v54, 0.0  ;;  %4724 = vst [vmem:[#allocation67_spill] sm:$0xff] %v3484_v62  ;;  %v1267_v15 = vsel %vm1039_vm3, %v3451_v24, %v1266_v40  ;;  %v3514_v58 = vrot.slane %v3038_v29, %v2850_v8  ;;  %v3522_v54 = vrot.slane %v3062_v57, %v2850_v8 }
  0x5a   : > { %v3489_v39 = vrot.slane %v473_v11, %v2848_v7  ;;  %4725 = vst [vmem:[#allocation68_spill] sm:$0xff] %v3510_v48  ;;  %v1268_v12 = vsel %vm1041_vm4, %v3455_v35, %v1267_v15  ;;  %v3526_v27 = vrot.slane %v3050_v51, %v2850_v8  ;;  %v3530_v55 = vrot.slane %v3076_v3, %v2850_v8 }
  0x5b   : > { %4726 = vst [vmem:[#allocation69_spill] sm:$0xff] %v3514_v58  ;;  %4727 = vst [vmem:[#allocation70_spill] sm:$0xff] %v3522_v54  ;;  %v1269_v29 = vsel %vm1043_vm5, %v3465_v26, %v1268_v12  ;;  %v1279_v57 = vsel %vm1035_vm1, %v3506_v28, %v3493_v47  ;;  %v1305_v40 = vrot.slane %v3427_v33, %v2861_v16 }
  0x5c   : > { %4728 = vst [vmem:[#allocation71_spill] sm:$0xff] %v3526_v27  ;;  %4729 = vst [vmem:[#allocation72_spill] sm:$0xff] %v3530_v55  ;;  %v1257_v11 = vrot.slane %v3489_v39, %v2850_v8  ;;  %v1270_v51 = vsel %vm1045_vm6, %v3469_v52, %v1269_v29  ;;  %v1280_v3 = vsel %vm1037_vm2, %v3510_v48, %v1279_v57  ;;  %v2611_v57 = vld [vmem:[%s3498_s12] sm:%s2610_s14] }
  0x5d   : > { %v1321_v15 = vsel %vm1035_vm1, %v2976_v59, %v2966_v56  ;;  %v1309_v12 = vrot.slane %v3372_v23, %v2861_v16  ;;  %v3551_v62 = vsel %vm1047_vm7, %v1249_v42, %v1270_v51  ;;  %v1281_v20 = vsel %vm1039_vm3, %v3514_v58, %v1280_v3  ;;  %v2614_v42 = vld [vmem:[%s3498_s12 + $0x8] sm:%s2610_s14]  ;;  %v4777_v58 = vld [vmem:[#allocation28_spill] sm:$0xff]  ;;  %s2724_s12 = smov 36   ;;  %s2725_s14 = smov 40  }
  0x5e   : > { %4730 = vst [vmem:[#allocation73_spill] sm:$0xff] %v3551_v62  ;;  %v1322_v33 = vsel %vm1037_vm2, %v2980_v60, %v1321_v15  ;;  %v1328_v29 = vsel %vm1035_vm1, %v2930_v44, %v2926_v43  ;;  %1288 = vrot.lane.b32.xlu0 %v3551_v62, %s2718_s8  ;;  %v1282_v56 = vsel %vm1041_vm4, %v3522_v54, %v1281_v20  ;;  %v4772_v54 = vld [vmem:[#allocation45_spill] sm:$0xff] }
  0x5f   : > { %v1323_v59 = vsel %vm1039_vm3, %v2990_v63, %v1322_v33  ;;  %v1329_v23 = vsel %vm1037_vm2, %v2946_v49, %v1328_v29  ;;  %v1283_v60 = vsel %vm1043_vm5, %v3526_v27, %v1282_v56  ;;  %v407_v49 = vrot.slane %v2611_v57, 7  ;;  %v4735_v56 = vld [vmem:[#allocation10_spill] sm:$0xff]  ;;  %v4769_v27 = vld [vmem:[#allocation41_spill] sm:$0xff] }
  0x60   : > { %v1324_v43 = vsel %vm1041_vm4, %v3000_v2, %v1323_v59  ;;  %v1330_v44 = vsel %vm1039_vm3, %v2907_v38, %v1329_v23  ;;  %v1284_v51 = vsel %vm1045_vm6, %v3530_v55, %v1283_v60  ;;  %v408_v38 = vrot.slane %v2614_v42, 7  ;;  %v4736_v60 = vld [vmem:[#allocation13_spill] sm:$0xff]  ;;  %v4767_v55 = vld [vmem:[#allocation16_spill] sm:$0xff] }
  0x61   : > { %v1325_v20 = vsel %vm1043_vm5, %v2994_v0, %v1324_v43  ;;  %v1331_v63 = vsel %vm1041_vm4, %v2934_v45, %v1330_v44  ;;  %v3583_v3 = vsel %vm1047_vm7, %v1257_v11, %v1284_v51  ;;  %v457_v0 = vsel %vm406_vm0, 0.0, %v407_v49 }
  0x62   : > { %4731 = vst [vmem:[#allocation74_spill] sm:$0xff] %v3583_v3  ;;  %v1326_v15 = vsel %vm1045_vm6, %v3013_v10, %v1325_v20  ;;  %v1332_v2 = vsel %vm1043_vm5, %v2938_v46, %v1331_v63  ;;  %1292 = vrot.lane.b32.xlu1 %v3583_v3, %s2718_s8  ;;  %v1313_v11 = vrot.slane %v3489_v39, %v2861_v16  ;;  %v467_v59 = vsel %vm406_vm0, %v408_v38, 0.0  ;;  %v4737_v20 = vld [vmem:[#allocation12_spill] sm:$0xff] }
  0x63   : > { %v3592_v33 = vsel %vm1047_vm7, %v1305_v40, %v1326_v15  ;;  %v1333_v45 = vsel %vm1045_vm6, %v2950_v50, %v1332_v2  ;;  %v409_v10 = vsel %vm406_vm0, %v407_v49, %v408_v38  ;;  %v497_v29 = vcombine.high %v457_v0, %v457_v0  ;;  %v4738_v38 = vld [vmem:[#allocation14_spill] sm:$0xff] }
  0x64   : > { %4732 = vst [vmem:[#allocation75_spill] sm:$0xff] %v3592_v33  ;;  %1344 = vrot.lane.b32.xlu0 %v3592_v33, %s2719_s23  ;;  %v3602_v46 = vsel %vm1047_vm7, %v1309_v12, %v1333_v45  ;;  %v3606_v40 = vrot.slane %v457_v0, %v2848_v7  ;;  %v514_v57 = vcombine.high %v409_v10, %v409_v10  ;;  %v4768_v35 = vrot.slane %v4767_v55, 7 }
  0x65   : > { %4733 = vst [vmem:[#allocation76_spill] sm:$0xff] %v3602_v46  ;;  %v521_v50 = vrot.slane %v409_v10, %v2848_v7  ;;  %v1335_v39 = vsel %vm1035_vm1, %v4735_v56, %v3080_v4  ;;  %v511_v23 = vrot.slane %v497_v29, %v2848_v7  ;;  %v3801_v18 = vrot.slane %v4755_v37, %v2861_v16 }
  0x66   : > { %4734 = vst [vmem:[#allocation77_spill] sm:$0xff] %v3606_v40  ;;  %v512_v12 = vcombine.high %v3606_v40, %v3606_v40  ;;  %v1077_v42 = vrot.slane %v3606_v40, %v2861_v16  ;;  %v1336_v43 = vsel %vm1037_vm2, %v4736_v60, %v1335_v39  ;;  %1346 = vrot.lane.b32.xlu1 %v3602_v46, %s2719_s23 }
  0x67   : > { %v528_v44 = vrot.slane %v514_v57, %v2848_v7  ;;  %v529_v51 = vcombine.high %v521_v50, %v521_v50  ;;  %v3624_v4 = vrot.slane %v521_v50, %v2861_v16  ;;  %v1337_v63 = vsel %vm1039_vm3, %v4737_v20, %v1336_v43  ;;  %v4739_v57 = vld [vmem:[#allocation15_spill] sm:$0xff]  ;;  %v4740_v43 = vld [vmem:[#allocation17_spill] sm:$0xff] }
  0x68   : > { %v513_v49 = vcombine.high %v511_v23, %v511_v23  ;;  %v1081_v15 = vrot.slane %v512_v12, %v2861_v16  ;;  %v1085_v2 = vrot.slane %v511_v23, %v2861_v16  ;;  %v1338_v45 = vsel %vm1041_vm4, %v4738_v38, %v1337_v63 }
  0x69   : > { %v530_v0 = vcombine.high %v528_v44, %v528_v44  ;;  %v1097_v10 = vrot.slane %v529_v51, %v2861_v16  ;;  %v1101_v29 = vrot.slane %v528_v44, %v2861_v16  ;;  %v1339_v56 = vsel %vm1043_vm5, %v4739_v57, %v1338_v45  ;;  %v366_v45 = vld [vmem:[%s2842_s27 + $0x60] sm:$0xff] }
  0x6a   : > { %v1089_v39 = vrot.slane %v513_v49, %v2861_v16  ;;  %v1202_v60 = vsel %vm1035_vm1, %v1081_v15, %v1077_v42  ;;  %v1340_v20 = vsel %vm1045_vm6, %v4740_v43, %v1339_v56  ;;  %v3641_v40 = vrot.slane %v467_v59, %v2848_v7 }
  0x6b   : > { %v1105_v63 = vrot.slane %v530_v0, %v2861_v16  ;;  %v1203_v38 = vsel %vm1037_vm2, %v1085_v2, %v1202_v60  ;;  %v3646_v46 = vsel %vm1047_vm7, %v1313_v11, %v1340_v20  ;;  %v3649_v33 = vrot.slane %v512_v12, %v2850_v8  ;;  %v3665_v11 = vld [vmem:[%s2842_s27 + $0x68] sm:$0xff] }
  0x6c   : > { %4741 = vst [vmem:[#allocation10_spill] sm:$0xff] %v3646_v46  ;;  %v1204_v57 = vsel %vm1039_vm3, %v1089_v39, %v1203_v38  ;;  %1348 = vrot.lane.b32.xlu1 %v3646_v46, %s2719_s23  ;;  %v3656_v42 = vrot.slane %v511_v23, %v2850_v8  ;;  %v3659_v59 = vrot.slane %v513_v49, %v2850_v8  ;;  %v428_v38 = vrot.slane %v366_v45, 7 }
  0x6d   : > { %4742 = vst [vmem:[#allocation13_spill] sm:$0xff] %v3649_v33  ;;  %v3662_v56 = vrot.slane %v521_v50, %v2850_v8  ;;  %v1205_v12 = vsel %vm1041_vm4, %v3624_v4, %v1204_v57  ;;  %v3670_v60 = vrot.slane %v529_v51, %v2850_v8  ;;  %v3673_v43 = vrot.slane %v528_v44, %v2850_v8 }
  0x6e   : > { %4743 = vst [vmem:[#allocation12_spill] sm:$0xff] %v3656_v42  ;;  %4744 = vst [vmem:[#allocation14_spill] sm:$0xff] %v3659_v59  ;;  %v3676_v23 = vrot.slane %v530_v0, %v2850_v8  ;;  %v1206_v49 = vsel %vm1043_vm5, %v1097_v10, %v1205_v12  ;;  %v1245_v50 = vrot.slane %v3641_v40, %v2850_v8  ;;  %v4628_v44 = vrot.slane %v3665_v11, 7 }
  0x6f   : > { %4745 = vst [vmem:[#allocation15_spill] sm:$0xff] %v3662_v56  ;;  %4746 = vst [vmem:[#allocation17_spill] sm:$0xff] %v3670_v60  ;;  %v1258_v20 = vsel %vm1035_vm1, %v3656_v42, %v3649_v33  ;;  %v1207_v57 = vsel %vm1045_vm6, %v1101_v29, %v1206_v49  ;;  %v1301_v0 = vrot.slane %v3641_v40, %v2861_v16  ;;  %v464_v62 = vsel %vm406_vm0, 0.0, %v428_v38 }
  0x70   : > { %4747 = vst [vmem:[#allocation78_spill] sm:$0xff] %v3673_v43  ;;  %4748 = vst [vmem:[#allocation79_spill] sm:$0xff] %v3676_v23  ;;  %v1259_v51 = vsel %vm1037_vm2, %v3659_v59, %v1258_v20  ;;  %v1208_v12 = vsel %vm1047_vm7, %v1105_v63, %v1207_v57  ;;  %v1314_v42 = vsel %vm1035_vm1, %v1085_v2, %v1081_v15 }
  0x71   : > { %v1260_v46 = vsel %vm1039_vm3, %v3662_v56, %v1259_v51  ;;  %1230 = vrot.lane.b32.xlu0 %v1208_v12, %s2716_s6  ;;  %v430_v49 = vsel %vm406_vm0, %v428_v38, %v4628_v44  ;;  %v784_v20 = vcombine.high %v464_v62, %v464_v62  ;;  %v3702_v40 = vrot.slane %v464_v62, %v2848_v7  ;;  %s2720_s6 = smov 20  }
  0x72   : > { %v1261_v45 = vsel %vm1041_vm4, %v3670_v60, %v1260_v46  ;;  %v801_v51 = vcombine.high %v430_v49, %v430_v49  ;;  %v3707_v56 = vrot.slane %v430_v49, %v2848_v7  ;;  %v1315_v15 = vsel %vm1037_vm2, %v1089_v39, %v1314_v42 }
  0x73   : > { %v1262_v57 = vsel %vm1043_vm5, %v3673_v43, %v1261_v45  ;;  %v798_v2 = vrot.slane %v784_v20, %v2848_v7  ;;  %v799_v38 = vcombine.high %v3702_v40, %v3702_v40  ;;  %v1453_v62 = vrot.slane %v3702_v40, %v2850_v8 }
  0x74   : > { %v1263_v46 = vsel %vm1045_vm6, %v3676_v23, %v1262_v57  ;;  %v815_v45 = vrot.slane %v801_v51, %v2848_v7  ;;  %v816_v49 = vcombine.high %v3707_v56, %v3707_v56  ;;  %v3723_v39 = vrot.slane %v3707_v56, %v2850_v8 }
  0x75   : > { %v1264_v12 = vsel %vm1047_vm7, %v1245_v50, %v1263_v46  ;;  %v800_v42 = vcombine.high %v798_v2, %v798_v2  ;;  %v3727_v20 = vrot.slane %v799_v38, %v2850_v8  ;;  %v3730_v57 = vrot.slane %v798_v2, %v2850_v8 }
  0x76   : > { %1286 = vrot.lane.b32.xlu0 %v1264_v12, %s2718_s8  ;;  %v1316_v50 = vsel %vm1039_vm3, %v3624_v4, %v1315_v15  ;;  %v817_v51 = vcombine.high %v815_v45, %v815_v45  ;;  %v3735_v46 = vrot.slane %v816_v49, %v2850_v8  ;;  %v3738_v44 = vrot.slane %v815_v45, %v2850_v8 }
  0x77   : > { %v1317_v23 = vsel %vm1041_vm4, %v1097_v10, %v1316_v50  ;;  %v3742_v12 = vrot.slane %v800_v42, %v2850_v8  ;;  %v1503_v43 = vsel %vm1035_vm1, %v3727_v20, %v1453_v62  ;;  %v1589_v4 = vrot.slane %v3213_v13, %v2861_v16 }
  0x78   : > { %v1318_v60 = vsel %vm1043_vm5, %v1101_v29, %v1317_v23  ;;  %v3750_v15 = vrot.slane %v817_v51, %v2850_v8  ;;  %v1504_v59 = vsel %vm1037_vm2, %v3730_v57, %v1503_v43  ;;  %v3757_v10 = vrot.slane %v3229_v19, %v2861_v16  ;;  %v4749_v23 = vld [vmem:[#allocation39_spill] sm:$0xff] }
  0x79   : > { %v1319_v33 = vsel %vm1045_vm6, %v1105_v63, %v1318_v60  ;;  %v1505_v62 = vsel %vm1039_vm3, %v3742_v12, %v1504_v59  ;;  %v3764_v13 = vrot.slane %v3225_v53, %v2861_v16  ;;  %v3768_v50 = vrot.slane %v4749_v23, %v2861_v16  ;;  %v4750_v19 = vld [vmem:[#allocation35_spill] sm:$0xff]  ;;  %v4751_v59 = vld [vmem:[#allocation37_spill] sm:$0xff]  ;;  %v4752_v53 = vld [vmem:[#allocation36_spill] sm:$0xff] }
  0x7a   : > { %v1320_v29 = vsel %vm1047_vm7, %v1301_v0, %v1319_v33  ;;  %v1506_v63 = vsel %vm1041_vm4, %v3723_v39, %v1505_v62  ;;  %v3775_v60 = vrot.slane %v4750_v19, %v2861_v16  ;;  %v3779_v33 = vrot.slane %v4751_v59, %v2861_v16  ;;  %v4753_v23 = vld [vmem:[#allocation40_spill] sm:$0xff]  ;;  %v4754_v19 = vld [vmem:[#allocation18_spill] sm:$0xff] }
  0x7b   : > { %1342 = vrot.lane.b32.xlu0 %v1320_v29, %s2719_s23  ;;  %v3783_v43 = vrot.slane %v4752_v53, %v2861_v16  ;;  %v1507_v0 = vsel %vm1043_vm5, %v3735_v46, %v1506_v63  ;;  %v3789_v62 = vrot.slane %v4753_v23, %v2861_v16  ;;  %v1664_v29 = vsel %vm1035_vm1, %v3757_v10, %v1589_v4  ;;  %v4756_v63 = vld [vmem:[#allocation21_spill] sm:$0xff]  ;;  %s2726_s23 = smov 44  }
  0x7c   : > { %v1525_v3 = vrot.slane %v4754_v19, %v2861_v16  ;;  %v1508_v59 = vsel %vm1045_vm6, %v3738_v44, %v1507_v0  ;;  %v1665_v53 = vsel %vm1037_vm2, %v3764_v13, %v1664_v29  ;;  %v3805_v23 = vrot.slane %v4756_v63, %v2861_v16  ;;  %v4758_v0 = vld [vmem:[#allocation26_spill] sm:$0xff]  ;;  %v4759_v29 = vld [vmem:[#allocation19_spill] sm:$0xff] }
  0x7d   : > { %v3809_v4 = vsel %vm1047_vm7, %v3750_v15, %v1508_v59  ;;  %v1666_v19 = vsel %vm1039_vm3, %v3768_v50, %v1665_v53  ;;  %v3815_v34 = vrot.slane %v4758_v0, %v2861_v16  ;;  %v3819_v22 = vrot.slane %v4759_v29, %v2861_v16  ;;  %v4760_v59 = vld [vmem:[#allocation23_spill] sm:$0xff]  ;;  %v4761_v53 = vld [vmem:[#allocation20_spill] sm:$0xff] }
  0x7e   : > { %4757 = vst [vmem:[#allocation39_spill] sm:$0xff] %v3809_v4  ;;  %1516 = vrot.lane.b32.xlu1 %v3809_v4, %s2717_s13  ;;  %v1667_v37 = vsel %vm1041_vm4, %v3775_v60, %v1666_v19  ;;  %v3827_v63 = vrot.slane %v4760_v59, %v2861_v16  ;;  %v3831_v17 = vrot.slane %v4761_v53, %v2861_v16  ;;  %v4762_v0 = vld [vmem:[#allocation24_spill] sm:$0xff]  ;;  %s2721_s13 = smov 24  }
  0x7f   : > { %v3835_v52 = vrot.slane %v4762_v0, %v2861_v16  ;;  %v1668_v29 = vsel %vm1043_vm5, %v3779_v33, %v1667_v37  ;;  %v1650_v4 = vsel %vm1035_vm1, %v3801_v18, %v1525_v3  ;;  %v1621_v19 = vrot.slane %v3702_v40, %v2861_v16 }
  0x80   : > { %v3844_v59 = vrot.slane %v799_v38, %v2861_v16  ;;  %v1669_v53 = vsel %vm1045_vm6, %v3783_v43, %v1668_v29  ;;  %v1651_v26 = vsel %vm1037_vm2, %v3805_v23, %v1650_v4  ;;  %v3851_v0 = vrot.slane %v798_v2, %v2861_v16 }
  0x81   : > { %v3854_v37 = vrot.slane %v800_v42, %v2861_v16  ;;  %v3858_v3 = vsel %vm1047_vm7, %v3789_v62, %v1669_v53  ;;  %v1652_v40 = vsel %vm1039_vm3, %v3815_v34, %v1651_v26  ;;  %v3864_v38 = vrot.slane %v3707_v56, %v2861_v16 }
  0x82   : > { %4763 = vst [vmem:[#allocation35_spill] sm:$0xff] %v3858_v3  ;;  %v3867_v29 = vrot.slane %v816_v49, %v2861_v16  ;;  %1682 = vrot.lane.b32.xlu1 %v3858_v3, %s2720_s6  ;;  %v1653_v2 = vsel %vm1041_vm4, %v3819_v22, %v1652_v40  ;;  %v3874_v42 = vrot.slane %v815_v45, %v2861_v16 }
  0x83   : > { %v3877_v4 = vrot.slane %v817_v51, %v2861_v16  ;;  %v1671_v26 = vsel %vm1035_vm1, %v3844_v59, %v1621_v19  ;;  %v1654_v56 = vsel %vm1043_vm5, %v3827_v63, %v1653_v2  ;;  %v1557_v53 = vrot.slane %v3301_v9, %v2861_v16 }
  0x84   : > { %v1672_v49 = vsel %vm1037_vm2, %v3851_v0, %v1671_v26  ;;  %v3889_v40 = vrot.slane %v3330_v31, %v2861_v16  ;;  %v1655_v45 = vsel %vm1045_vm6, %v3831_v17, %v1654_v56  ;;  %v3897_v19 = vrot.slane %v3326_v14, %v2861_v16  ;;  %v4764_v56 = vld [vmem:[#allocation48_spill] sm:$0xff] }
  0x85   : > { %v1673_v51 = vsel %vm1039_vm3, %v3854_v37, %v1672_v49  ;;  %v3901_v2 = vrot.slane %v3355_v6, %v2861_v16  ;;  %v1656_v9 = vsel %vm1047_vm7, %v3835_v52, %v1655_v45  ;;  %v3909_v26 = vrot.slane %v3296_v61, %v2861_v16  ;;  %v4765_v6 = vld [vmem:[#allocation47_spill] sm:$0xff]  ;;  %v4766_v45 = vld [vmem:[#allocation49_spill] sm:$0xff] }
  0x86   : > { %v1674_v31 = vsel %vm1041_vm4, %v3864_v38, %v1673_v51  ;;  %v3913_v49 = vrot.slane %v4764_v56, %v2861_v16  ;;  %1678 = vrot.lane.b32.xlu0 %v1656_v9, %s2720_s6  ;;  %v3920_v3 = vrot.slane %v4765_v6, %v2861_v16  ;;  %v3924_v51 = vrot.slane %v4766_v45, %v2861_v16  ;;  %v4770_v6 = vld [vmem:[#allocation42_spill] sm:$0xff] }
  0x87   : > { %v1675_v14 = vsel %vm1043_vm5, %v3867_v29, %v1674_v31  ;;  %v1657_v61 = vsel %vm1035_vm1, %v3889_v40, %v1557_v53  ;;  %v472_v31 = vsel %vm406_vm0, %v4768_v35, 0.0  ;;  %v1720_v24 = vsel %vm1035_vm1, %v4770_v6, %v4769_v27  ;;  %v4773_v27 = vld [vmem:[#allocation38_spill] sm:$0xff] }
  0x88   : > { %v1676_v56 = vsel %vm1045_vm6, %v3874_v42, %v1675_v14  ;;  %v1658_v9 = vsel %vm1037_vm2, %v3897_v19, %v1657_v61  ;;  %v3945_v14 = vrot.slane %v472_v31, %v2848_v7  ;;  %v1721_v61 = vsel %vm1037_vm2, %v4772_v54, %v1720_v24 }
  0x89   : > { %v3940_v45 = vsel %vm1047_vm7, %v3877_v4, %v1676_v56  ;;  %v1659_v53 = vsel %vm1039_vm3, %v3901_v2, %v1658_v9  ;;  %v1722_v55 = vsel %vm1039_vm3, %v4773_v27, %v1721_v61  ;;  %v4774_v56 = vld [vmem:[#allocation7_spill] sm:$0xff]  ;;  %v4779_v27 = vld [vmem:[#allocation44_spill] sm:$0xff] }
  0x8a   : > { %4771 = vst [vmem:[#allocation37_spill] sm:$0xff] %v3940_v45  ;;  %1684 = vrot.lane.b32.xlu1 %v3940_v45, %s2720_s6  ;;  %v1660_v35 = vsel %vm1041_vm4, %v3909_v26, %v1659_v53  ;;  %v4775_v6 = vrot.slane %v4774_v56, 7  ;;  %v4776_v9 = vld [vmem:[#allocation27_spill] sm:$0xff]  ;;  %v1701_v54 = vrot.slane %v3945_v14, %v2850_v8 }
  0x8b   : > { %v1706_v31 = vsel %vm1035_vm1, %v4777_v58, %v4776_v9  ;;  %v1661_v24 = vsel %vm1043_vm5, %v3913_v49, %v1660_v35  ;;  %v4778_v45 = vld [vmem:[#allocation43_spill] sm:$0xff]  ;;  %v4781_v35 = vrot.slane %v3665_v11, 7 }
  0x8c   : > { %v468_v41 = vsel %vm406_vm0, %v4775_v6, 0.0  ;;  %v1723_v53 = vsel %vm1041_vm4, %v4778_v45, %v1722_v55  ;;  %v1662_v61 = vsel %vm1045_vm6, %v3920_v3, %v1661_v24  ;;  %v4780_v6 = vld [vmem:[#allocation34_spill] sm:$0xff]  ;;  %v4783_v24 = vld [vmem:[#allocation25_spill] sm:$0xff] }
  0x8d   : > { %v3968_v36 = vrot.slane %v468_v41, %v2848_v7  ;;  %v1724_v56 = vsel %vm1043_vm5, %v4779_v27, %v1723_v53  ;;  %v1707_v58 = vsel %vm1037_vm2, %v4780_v6, %v1706_v31  ;;  %v474_v9 = vsel %vm406_vm0, %v4781_v35, 0.0  ;;  %v4782_v45 = vld [vmem:[#allocation46_spill] sm:$0xff]  ;;  %v4785_v6 = vld [vmem:[#allocation31_spill] sm:$0xff]  ;;  %v4786_v35 = vld [vmem:[#allocation33_spill] sm:$0xff] }
  0x8e   : > { %v3981_v48 = vsel %vm1047_vm7, %v3924_v51, %v1662_v61  ;;  %v1725_v41 = vsel %vm1045_vm6, %v4782_v45, %v1724_v56  ;;  %v1708_v53 = vsel %vm1039_vm3, %v4783_v24, %v1707_v58  ;;  %v4784_v31 = vld [vmem:[#allocation30_spill] sm:$0xff]  ;;  %v3997_v61 = vrot.slane %v474_v9, %v2848_v7  ;;  %v4788_v9 = vld [vmem:[#allocation51_spill] sm:$0xff] }
  0x8f   : > { %v1693_v55 = vrot.slane %v3968_v36, %v2850_v8  ;;  %1680 = vrot.lane.b32.xlu0 %v3981_v48, %s2720_s6  ;;  %v3992_v11 = vsel %vm1047_vm7, %v1701_v54, %v1725_v41  ;;  %v1709_v27 = vsel %vm1041_vm4, %v4784_v31, %v1708_v53  ;;  %v1727_v56 = vsel %vm1035_vm1, %v3730_v57, %v3727_v20  ;;  %v4789_v53 = vld [vmem:[#allocation32_spill] sm:$0xff] }
  0x90   : > { %1738 = vrot.lane.b32.xlu1 %v3992_v11, %s2721_s13  ;;  %v1710_v58 = vsel %vm1043_vm5, %v4785_v6, %v1709_v27  ;;  %v1728_v54 = vsel %vm1037_vm2, %v3742_v12, %v1727_v56  ;;  %v4787_v45 = vrot.slane %v4786_v35, 7  ;;  %v1713_v24 = vsel %vm1035_vm1, %v4788_v9, %v3359_v30  ;;  %v4790_v6 = vld [vmem:[#allocation54_spill] sm:$0xff]  ;;  %v4791_v9 = vld [vmem:[#allocation9_spill] sm:$0xff] }
  0x91   : > { %v1711_v20 = vsel %vm1045_vm6, %v4789_v53, %v1710_v58  ;;  %v1705_v57 = vrot.slane %v3997_v61, %v2850_v8  ;;  %v1729_v31 = vsel %vm1039_vm3, %v3723_v39, %v1728_v54  ;;  %v1714_v30 = vsel %vm1037_vm2, %v4790_v6, %v1713_v24 }
  0x92   : > { %v470_v41 = vsel %vm406_vm0, %v4787_v45, 0.0  ;;  %v1712_v12 = vsel %vm1047_vm7, %v1693_v55, %v1711_v20  ;;  %v1730_v56 = vsel %vm1041_vm4, %v3735_v46, %v1729_v31  ;;  %v1757_v58 = vrot.slane %v3945_v14, %v2861_v16  ;;  %v4116_v20 = vld [vmem:[%s2842_s27 + $0x78] sm:$0xff] }
  0x93   : > { %v4021_v27 = vrot.slane %v470_v41, %v2848_v7  ;;  %1734 = vrot.lane.b32.xlu0 %v1712_v12, %s2721_s13  ;;  %v1731_v35 = vsel %vm1043_vm5, %v3738_v44, %v1730_v56  ;;  %v1715_v55 = vsel %vm1039_vm3, %v3317_v32, %v1714_v30  ;;  %v1776_v46 = vsel %vm1035_vm1, %v3764_v13, %v3757_v10  ;;  %v4794_v56 = vld [vmem:[#allocation60_spill] sm:$0xff] }
  0x94   : > { %v1732_v54 = vsel %vm1045_vm6, %v3750_v15, %v1731_v35  ;;  %v1716_v14 = vsel %vm1041_vm4, %v3342_v5, %v1715_v55  ;;  %v1777_v45 = vsel %vm1037_vm2, %v3768_v50, %v1776_v46  ;;  %v1749_v44 = vrot.slane %v3968_v36, %v2861_v16  ;;  %v4798_v46 = vld [vmem:[#allocation62_spill] sm:$0xff] }
  0x95   : > { %v1697_v39 = vrot.slane %v4021_v27, %v2850_v8  ;;  %v4049_v41 = vsel %vm1047_vm7, %v1705_v57, %v1732_v54  ;;  %v1717_v32 = vsel %vm1043_vm5, %v3346_v1, %v1716_v14  ;;  %v1778_v10 = vsel %vm1039_vm3, %v3775_v60, %v1777_v45 }
  0x96   : > { %v1762_v15 = vsel %vm1035_vm1, %v3805_v23, %v3801_v18  ;;  %1740 = vrot.lane.b32.xlu1 %v4049_v41, %s2721_s13  ;;  %v1718_v5 = vsel %vm1045_vm6, %v3369_v25, %v1717_v32  ;;  %v1779_v36 = vsel %vm1041_vm4, %v3779_v33, %v1778_v10  ;;  %v1761_v13 = vrot.slane %v3997_v61, %v2861_v16  ;;  %v4800_v10 = vld [vmem:[#allocation63_spill] sm:$0xff] }
  0x97   : > { %v1763_v1 = vsel %vm1037_vm2, %v3815_v34, %v1762_v15  ;;  %v4069_v50 = vsel %vm1047_vm7, %v1697_v39, %v1718_v5  ;;  %v1780_v18 = vsel %vm1043_vm5, %v3783_v43, %v1779_v36  ;;  %v1783_v25 = vsel %vm1035_vm1, %v3851_v0, %v3844_v59 }
  0x98   : > { %v1764_v60 = vsel %vm1039_vm3, %v3819_v22, %v1763_v1  ;;  %1736 = vrot.lane.b32.xlu0 %v4069_v50, %s2721_s13  ;;  %v1781_v34 = vsel %vm1045_vm6, %v3789_v62, %v1780_v18  ;;  %v1784_v23 = vsel %vm1037_vm2, %v3854_v37, %v1783_v25  ;;  %v1753_v43 = vrot.slane %v4021_v27, %v2861_v16  ;;  %v4801_v1 = vld [vmem:[#allocation72_spill] sm:$0xff]  ;;  %v4802_v18 = vld [vmem:[#allocation65_spill] sm:$0xff] }
  0x99   : > { %v1765_v33 = vsel %vm1041_vm4, %v3827_v63, %v1764_v60  ;;  %v4089_v22 = vsel %vm1047_vm7, %v1757_v58, %v1781_v34  ;;  %v1785_v0 = vsel %vm1039_vm3, %v3864_v38, %v1784_v23  ;;  %v1769_v62 = vsel %vm1035_vm1, %v3897_v19, %v3889_v40  ;;  %v368_v63 = vld [vmem:[%s2842_s27 + $0x70] sm:$0xff]  ;;  %v4796_v58 = vld [vmem:[#allocation61_spill] sm:$0xff]  ;;  %s2723_s27 = smov 32  }
  0x9a   : > { %v1766_v59 = vsel %vm1043_vm5, %v3831_v17, %v1765_v33  ;;  %1794 = vrot.lane.b32.xlu1 %v4089_v22, %s2722_s24  ;;  %v1786_v61 = vsel %vm1041_vm4, %v3867_v29, %v1785_v0  ;;  %v1770_v17 = vsel %vm1037_vm2, %v3901_v2, %v1769_v62  ;;  %v1006_v38 = vrot.slane %v4791_v9, %v2850_v8  ;;  %v4803_v33 = vld [vmem:[#allocation66_spill] sm:$0xff]  ;;  %v4804_v9 = vld [vmem:[#allocation5_spill] sm:$0xff] }
  0x9b   : > { %v1767_v37 = vsel %vm1045_vm6, %v3835_v52, %v1766_v59  ;;  %v1787_v40 = vsel %vm1043_vm5, %v3874_v42, %v1786_v61  ;;  %v1771_v19 = vsel %vm1039_vm3, %v3909_v26, %v1770_v17  ;;  %v4792_v52 = vld [vmem:[#allocation6_spill] sm:$0xff]  ;;  %v431_v31 = vrot.slane %v368_v63, 7 }
  0x9c   : > { %v1768_v24 = vsel %vm1047_vm7, %v1749_v44, %v1767_v37  ;;  %v942_v53 = vrot.slane %v4792_v52, %v2850_v8  ;;  %v1788_v29 = vsel %vm1045_vm6, %v3877_v4, %v1787_v40  ;;  %v1772_v2 = vsel %vm1041_vm4, %v3913_v49, %v1771_v19  ;;  %v4799_v44 = vld [vmem:[#allocation71_spill] sm:$0xff] }
  0x9d   : > { %1790 = vrot.lane.b32.xlu0 %v1768_v24, %s2722_s24  ;;  %v1063_v57 = vsel %vm1035_vm1, %v3493_v47, %v1006_v38  ;;  %v4125_v42 = vsel %vm1047_vm7, %v1761_v13, %v1788_v29  ;;  %v1773_v26 = vsel %vm1043_vm5, %v3920_v3, %v1772_v2  ;;  %v4793_v47 = vld [vmem:[#allocation68_spill] sm:$0xff]  ;;  %v432_v3 = vrot.slane %v4116_v20, 7 }
  0x9e   : > { %v1064_v27 = vsel %vm1037_vm2, %v3506_v28, %v1063_v57  ;;  %v1049_v12 = vsel %vm1035_vm1, %v3431_v21, %v942_v53  ;;  %1796 = vrot.lane.b32.xlu1 %v4125_v42, %s2722_s24  ;;  %v1774_v4 = vsel %vm1045_vm6, %v3924_v51, %v1773_v26  ;;  %v4795_v28 = vld [vmem:[#allocation69_spill] sm:$0xff]  ;;  %v465_v39 = vsel %vm406_vm0, 0.0, %v431_v31  ;;  %v4797_v51 = vld [vmem:[#allocation70_spill] sm:$0xff]  ;;  %v4805_v2 = vld [vmem:[#allocation52_spill] sm:$0xff] }
  0x9f   : > { %v1065_v49 = vsel %vm1039_vm3, %v4793_v47, %v1064_v27  ;;  %v1050_v6 = vsel %vm1037_vm2, %v4794_v56, %v1049_v12  ;;  %v4143_v30 = vsel %vm1047_vm7, %v1753_v43, %v1774_v4  ;;  %v433_v14 = vsel %vm406_vm0, %v431_v31, %v432_v3  ;;  %v4806_v12 = vld [vmem:[#allocation53_spill] sm:$0xff] }
  0xa0   : > { %v1066_v21 = vsel %vm1041_vm4, %v4795_v28, %v1065_v49  ;;  %v1051_v35 = vsel %vm1039_vm3, %v4796_v58, %v1050_v6  ;;  %v825_v45 = vcombine.high %v465_v39, %v465_v39  ;;  %v832_v5 = vrot.slane %v465_v39, %v2848_v7  ;;  %v4807_v6 = vld [vmem:[#allocation55_spill] sm:$0xff] }
  0xa1   : > { %1792 = vrot.lane.b32.xlu0 %v4143_v30, %s2722_s24  ;;  %v1067_v55 = vsel %vm1043_vm5, %v4797_v51, %v1066_v21  ;;  %v1052_v54 = vsel %vm1041_vm4, %v4798_v46, %v1051_v35  ;;  %v842_v36 = vcombine.high %v433_v14, %v433_v14  ;;  %v849_v34 = vrot.slane %v433_v14, %v2848_v7  ;;  %v4808_v35 = vld [vmem:[#allocation56_spill] sm:$0xff]  ;;  %s2727_s24 = smov 48  }
  0xa2   : > { %v1068_v32 = vsel %vm1045_vm6, %v4799_v44, %v1067_v55  ;;  %v1053_v15 = vsel %vm1043_vm5, %v4800_v10, %v1052_v54  ;;  %v839_v25 = vrot.slane %v825_v45, %v2848_v7  ;;  %v840_v43 = vcombine.high %v832_v5, %v832_v5  ;;  %v4809_v54 = vld [vmem:[#allocation57_spill] sm:$0xff] }
  0xa3   : > { %v4165_v13 = vsel %vm1047_vm7, %v4801_v1, %v1068_v32  ;;  %v1054_v60 = vsel %vm1045_vm6, %v4802_v18, %v1053_v15  ;;  %v856_v59 = vrot.slane %v842_v36, %v2848_v7  ;;  %v1805_v0 = vrot.slane %v832_v5, %v2850_v8  ;;  %v4810_v32 = vld [vmem:[#allocation58_spill] sm:$0xff]  ;;  %v4811_v1 = vld [vmem:[#allocation59_spill] sm:$0xff] }
  0xa4   : > { %1845 = vrot.lane.b32.xlu1 %v4165_v13, %s2723_s27  ;;  %v4175_v23 = vsel %vm1047_vm7, %v4803_v33, %v1054_v60  ;;  %v841_v62 = vcombine.high %v839_v25, %v839_v25  ;;  %v857_v63 = vcombine.high %v849_v34, %v849_v34  ;;  %v1813_v37 = vrot.slane %v839_v25, %v2850_v8 }
  0xa5   : > { %1841 = vrot.lane.b32.xlu0 %v4175_v23, %s2723_s27  ;;  %v858_v61 = vcombine.high %v856_v59, %v856_v59  ;;  %v1809_v17 = vrot.slane %v840_v43, %v2850_v8  ;;  %v974_v38 = vrot.slane %v4804_v9, %v2850_v8  ;;  %v1821_v40 = vrot.slane %v849_v34, %v2850_v8 }
  0xa6   : > { %v1817_v24 = vrot.slane %v841_v62, %v2850_v8  ;;  %v1856_v19 = vrot.slane %v832_v5, %v2861_v16  ;;  %v1860_v52 = vrot.slane %v840_v43, %v2861_v16  ;;  %v1825_v53 = vrot.slane %v857_v63, %v2850_v8 }
  0xa7   : > { %v1834_v29 = vsel %vm1035_vm1, %v1809_v17, %v1805_v0  ;;  %v1056_v57 = vsel %vm1035_vm1, %v4805_v2, %v974_v38  ;;  %v1864_v31 = vrot.slane %v839_v25, %v2861_v16  ;;  %v1829_v26 = vrot.slane %v856_v59, %v2850_v8  ;;  %v4812_v38 = vld [vmem:[#allocation29_spill] sm:$0xff] }
  0xa8   : > { %v1835_v27 = vsel %vm1037_vm2, %v1813_v37, %v1834_v29  ;;  %v1057_v4 = vsel %vm1037_vm2, %v4806_v12, %v1056_v57  ;;  %v1868_v47 = vrot.slane %v841_v62, %v2861_v16  ;;  %v1833_v49 = vrot.slane %v858_v61, %v2850_v8  ;;  %v4237_v62 = vld [vmem:[%s348_s5 + $0x8] sm:%s2616_s11] }
  0xa9   : > { %v1836_v56 = vsel %vm1039_vm3, %v1817_v24, %v1835_v27  ;;  %v1058_v28 = vsel %vm1039_vm3, %v4807_v6, %v1057_v4  ;;  %v1872_v21 = vrot.slane %v849_v34, %v2861_v16  ;;  %v1876_v51 = vrot.slane %v857_v63, %v2861_v16  ;;  %v2617_v34 = vld [vmem:[%s348_s5] sm:%s2616_s11]  ;;  %s305_s5 = sand.u32 1, %s2689_s16  }
  0xaa   : > { %v1837_v58 = vsel %vm1041_vm4, %v1821_v40, %v1836_v56  ;;  %v1059_v39 = vsel %vm1041_vm4, %v4808_v35, %v1058_v28  ;;  %v1885_v55 = vsel %vm1035_vm1, %v1860_v52, %v1856_v19  ;;  %v1880_v15 = vrot.slane %v856_v59, %v2861_v16  ;;  %v4813_v19 = vld [vmem:[#allocation11_spill] sm:$0xff] }
  0xab   : > { %v1838_v46 = vsel %vm1043_vm5, %v1825_v53, %v1837_v58  ;;  %v1060_v14 = vsel %vm1043_vm5, %v4809_v54, %v1059_v39  ;;  %v1886_v45 = vsel %vm1037_vm2, %v1864_v31, %v1885_v55  ;;  %v1908_v25 = vsel %vm1035_vm1, %v1813_v37, %v1809_v17  ;;  %v4816_v54 = vld [vmem:[#allocation73_spill] sm:$0xff] }
  0xac   : > { %v1839_v44 = vsel %vm1045_vm6, %v1829_v26, %v1838_v46  ;;  %v1061_v10 = vsel %vm1045_vm6, %v4810_v32, %v1060_v14  ;;  %v1887_v5 = vsel %vm1039_vm3, %v1868_v47, %v1886_v45  ;;  %v1909_v43 = vsel %vm1037_vm2, %v1817_v24, %v1908_v25  ;;  %v4815_v46 = vld [vmem:[#allocation74_spill] sm:$0xff]  ;;  %v1233_v45 = vpop.permute.xlu1 %1232 }
  0xad   : > { %v1840_v36 = vsel %vm1047_vm7, %v1833_v49, %v1839_v44  ;;  %v1062_v18 = vsel %vm1047_vm7, %v4811_v1, %v1061_v10  ;;  %v1888_v60 = vsel %vm1041_vm4, %v1872_v21, %v1887_v5  ;;  %v1884_v59 = vrot.slane %v858_v61, %v2861_v16 }
  0xae   : > { %1847 = vrot.lane.b32.xlu1 %v1840_v36, %s2723_s27  ;;  %1843 = vrot.lane.b32.xlu0 %v1062_v18, %s2723_s27  ;;  %v1889_v33 = vsel %vm1043_vm5, %v1876_v51, %v1888_v60  ;;  %v1910_v0 = vsel %vm1039_vm3, %v1821_v40, %v1909_v43  ;;  %v475_v37 = vsel %vm406_vm0, %v432_v3, 0.0  ;;  %v1931_v17 = vsel %vm1035_vm1, %v1864_v31, %v1860_v52  ;;  %v1235_v40 = vpop.permute.xlu0 %1234 }
  0xaf   : > { %v1890_v63 = vsel %vm1045_vm6, %v1880_v15, %v1889_v33  ;;  %v434_v9 = vrot.slane %v2617_v34, 7  ;;  %v1911_v61 = vsel %vm1041_vm4, %v1825_v53, %v1910_v0  ;;  %v435_v24 = vrot.slane %v4237_v62, 7  ;;  %v4814_v53 = vld [vmem:[#allocation8_spill] sm:$0xff] }
  0xb0   : > { %v1891_v29 = vsel %vm1047_vm7, %v1884_v59, %v1890_v63  ;;  %v865_v20 = vrot.slane %v475_v37, %v2848_v7  ;;  %v1932_v52 = vsel %vm1037_vm2, %v1868_v47, %v1931_v17  ;;  %v1912_v31 = vsel %vm1043_vm5, %v1829_v26, %v1911_v61  ;;  %v1237_v63 = vpop.permute.xlu1 %1236 }
  0xb1   : > { %v466_v3 = vsel %vm406_vm0, 0.0, %v434_v9  ;;  %v4255_v27 = vsel %vm2098_vm8, %v1062_v18, %v1235_v40  ;;  %v436_v12 = vsel %vm406_vm0, %v434_v9, %v435_v24  ;;  %v1933_v6 = vsel %vm1039_vm3, %v1872_v21, %v1932_v52  ;;  %v4818_v9 = vld [vmem:[#allocation10_spill] sm:$0xff]  ;;  %v4820_v52 = vld [vmem:[#allocation76_spill] sm:$0xff] }
  0xb2   : > { %1896 = vrot.lane.b32.xlu1 %v4812_v38, %s2724_s12  ;;  %1892 = vrot.lane.b32.xlu0 %v4813_v19, %s2724_s12  ;;  %v866_v2 = vcombine.high %v466_v3, %v466_v3  ;;  %v873_v57 = vrot.slane %v466_v3, %v2848_v7  ;;  %v1907_v47 = vrot.slane %v865_v20, %v2850_v8  ;;  %v4819_v38 = vld [vmem:[#allocation75_spill] sm:$0xff] }
  0xb3   : > { %v1913_v26 = vsel %vm1045_vm6, %v1833_v49, %v1912_v31  ;;  %v890_v55 = vrot.slane %v436_v12, %v2848_v7  ;;  %v1934_v14 = vsel %vm1041_vm4, %v1876_v51, %v1933_v6  ;;  %v883_v49 = vcombine.high %v436_v12, %v436_v12  ;;  %v4817_v51 = vld [vmem:[#allocation67_spill] sm:$0xff] }
  0xb4   : > { %v880_v4 = vrot.slane %v866_v2, %v2848_v7  ;;  %v881_v56 = vcombine.high %v873_v57, %v873_v57  ;;  %v1953_v28 = vrot.slane %v873_v57, %v2850_v8  ;;  %v1914_v44 = vsel %vm1047_vm7, %v1907_v47, %v1913_v26  ;;  %v2180_v47 = vld [vmem:[%s4563_s3 + $0x38] sm:$0xff]  ;;  %v4821_v6 = vld [vmem:[#allocation39_spill] sm:$0xff] }
  0xb5   : > { %v1935_v5 = vsel %vm1043_vm5, %v1880_v15, %v1934_v14  ;;  %v898_v36 = vcombine.high %v890_v55, %v890_v55  ;;  %v2004_v1 = vrot.slane %v873_v57, %v2861_v16  ;;  %v1969_v60 = vrot.slane %v890_v55, %v2850_v8  ;;  %2483 = vmatprep.subr.mxu0 %v2180_v47  ;;  %v2178_v14 = vld [vmem:[%s4563_s3 + $0x28] sm:$0xff] }
  0xb6   : > { %1898 = vrot.lane.b32.xlu1 %v1891_v29, %s2724_s12  ;;  %1894 = vrot.lane.b32.xlu0 %v4814_v53, %s2724_s12  ;;  %v882_v58 = vcombine.high %v880_v4, %v880_v4  ;;  %v1957_v35 = vrot.slane %v881_v56, %v2850_v8  ;;  %v1961_v39 = vrot.slane %v880_v4, %v2850_v8  ;;  %s2728_s12 = smov 52  }
  0xb7   : > { %v4279_v18 = vrot.slane %v881_v56, %v2861_v16  ;;  %v1930_v25 = vrot.slane %v865_v20, %v2861_v16  ;;  %v897_v34 = vrot.slane %v883_v49, %v2848_v7  ;;  %v1936_v43 = vsel %vm1045_vm6, %v1884_v59, %v1935_v5  ;;  %v4320_v31 = vpop.permute.xlu0 %1510  ;;  %2505 = vmatprep.subr.mxu1 %v2180_v47 }
  0xb8   : > { %v1982_v21 = vsel %vm1035_vm1, %v1957_v35, %v1953_v28  ;;  %v1965_v32 = vrot.slane %v882_v58, %v2850_v8  ;;  %v2012_v15 = vrot.slane %v880_v4, %v2861_v16  ;;  %v4290_v0 = vsel %vm2098_vm8, %v4175_v23, %v1233_v45  ;;  %v4822_v28 = vld [vmem:[#allocation64_spill] sm:$0xff]  ;;  %2484 = vmatpush3.msra.mxu0 %v2180_v47 }
  0xb9   : > { %v1983_v10 = vsel %vm1037_vm2, %v1961_v39, %v1982_v21  ;;  %v4293_v37 = vrot.slane %v898_v36, %v2850_v8  ;;  %v2033_v17 = vsel %vm1035_vm1, %v4279_v18, %v2004_v1  ;;  %v1937_v19 = vsel %vm1047_vm7, %v1930_v25, %v1936_v43  ;;  %2513 = vmatpush3.msra.mxu1 %v2180_v47  ;;  %v4823_v21 = vld [vmem:[#allocation50_spill] sm:$0xff]  ;;  %v4826_v43 = vld [vmem:[#allocation13_spill] sm:$0xff] }
  0xba   : > { %1919 = vrot.lane.b32.xlu1 %v4815_v46, %s2725_s14  ;;  %1915 = vrot.lane.b32.xlu0 %v4816_v54, %s2725_s14  ;;  %v1984_v33 = vsel %vm1039_vm3, %v1965_v32, %v1983_v10  ;;  %v899_v61 = vcombine.high %v897_v34, %v897_v34  ;;  %v2016_v23 = vrot.slane %v882_v58, %v2861_v16  ;;  %v2179_v58 = vld [vmem:[%s4563_s3 + $0x30] sm:$0xff]  ;;  %v476_v5 = vsel %vm406_vm0, %v435_v24, 0.0  ;;  %v2176_v24 = vld [vmem:[%s4563_s3 + $0x18] sm:$0xff] }
  0xbb   : > { %v1985_v59 = vsel %vm1041_vm4, %v1969_v60, %v1984_v33  ;;  %v4304_v40 = vsel %vm2098_vm8, %v4165_v13, %v1237_v63  ;;  %v4307_v29 = vrot.slane %v897_v34, %v2850_v8  ;;  %v2034_v20 = vsel %vm1037_vm2, %v2012_v15, %v2033_v17  ;;  %2485 = vmatprep.subr.mxu0 %v2179_v58 }
  0xbc   : > { %v1986_v3 = vsel %vm1043_vm5, %v4293_v37, %v1985_v59  ;;  %v4314_v2 = vrot.slane %v890_v55, %v2861_v16  ;;  %v4317_v57 = vrot.slane %v899_v61, %v2850_v8  ;;  %v2035_v13 = vsel %vm1039_vm3, %v2016_v23, %v2034_v20  ;;  %2506 = vmatprep.subr.mxu1 %v2179_v58 }
  0xbd   : > { %v1987_v53 = vsel %vm1045_vm6, %v4307_v29, %v1986_v3  ;;  %v4327_v4 = vrot.slane %v898_v36, %v2861_v16  ;;  %v2056_v56 = vsel %vm1035_vm1, %v1961_v39, %v1957_v35  ;;  %v4343_v35 = vrot.slane %v897_v34, %v2861_v16  ;;  %2486 = vmatpush3.msra.mxu0 %v2179_v58  ;;  %v4824_v36 = vld [vmem:[#allocation77_spill] sm:$0xff] }
  0xbe   : > { %1921 = vrot.lane.b32.xlu1 %v1914_v44, %s2725_s14  ;;  %1917 = vrot.lane.b32.xlu0 %v4817_v51, %s2725_s14  ;;  %v2036_v26 = vsel %vm1041_vm4, %v4314_v2, %v2035_v13  ;;  %v1988_v55 = vsel %vm1047_vm7, %v4317_v57, %v1987_v53  ;;  %v2057_v39 = vsel %vm1037_vm2, %v1965_v32, %v2056_v56  ;;  %v2177_v51 = vld [vmem:[%s4563_s3 + $0x20] sm:$0xff]  ;;  %v4830_v53 = vld [vmem:[#allocation15_spill] sm:$0xff]  ;;  %vm2138_vm0 = vcmask 293888   ;;  %s2464_s14 = sshll.u32 %s2697_s18, 2 }
  0xbf   : > { %v4324_v12 = vpop.permute.xlu1 %1514  ;;  %v2037_v46 = vsel %vm1043_vm5, %v4327_v4, %v2036_v26  ;;  %v4355_v44 = vrot.slane %v899_v61, %v2861_v16  ;;  %v2058_v49 = vsel %vm1039_vm3, %v1969_v60, %v2057_v39  ;;  %2514 = vmatpush3.msra.mxu1 %v2179_v58  ;;  %v910_v1 = vrot.slane %v4824_v36, %v2850_v8  ;;  %v4825_v60 = vld [vmem:[#allocation37_spill] sm:$0xff]  ;;  %v4833_v39 = vld [vmem:[#allocation79_spill] sm:$0xff] }
  0xc0   : > { %v2038_v10 = vsel %vm1045_vm6, %v4343_v35, %v2037_v46  ;;  %2487 = vmatprep.subr.mxu0 %v2178_v14  ;;  %2507 = vmatprep.subr.mxu1 %v2178_v14  ;;  %v2059_v62 = vsel %vm1041_vm4, %v4293_v37, %v2058_v49  ;;  %v4382_v34 = vrot.slane %v476_v5, %v2848_v7  ;;  %v2175_v7 = vld [vmem:[%s4563_s3 + $0x10] sm:$0xff] }
  0xc1   : > { %2488 = vmatpush3.msra.mxu0 %v2178_v14  ;;  %2515 = vmatpush3.msra.mxu1 %v2178_v14  ;;  %v2039_v25 = vsel %vm1047_vm7, %v4355_v44, %v2038_v10  ;;  %v2060_v63 = vsel %vm1043_vm5, %v4307_v29, %v2059_v62  ;;  %v4827_v37 = vld [vmem:[#allocation35_spill] sm:$0xff] }
  0xc2   : > { %1942 = vrot.lane.b32.xlu1 %v4818_v9, %s2726_s23  ;;  %1938 = vrot.lane.b32.xlu0 %v4819_v38, %s2726_s23  ;;  %v4828_v38 = vld [vmem:[#allocation12_spill] sm:$0xff]  ;;  %v2078_v47 = vrot.slane %v4382_v34, %v2861_v16 }
  0xc3   : > { %2489 = vmatprep.subr.mxu0 %v2177_v51  ;;  %2508 = vmatprep.subr.mxu1 %v2177_v51 }
  0xc4   : > { %2490 = vmatpush3.msra.mxu0 %v2177_v51  ;;  %2516 = vmatpush3.msra.mxu1 %v2177_v51 }
  0xc5   : > { %2491 = vmatprep.subr.mxu0 %v2176_v24  ;;  %2509 = vmatprep.subr.mxu1 %v2176_v24 }
  0xc6   : > { %1944 = vrot.lane.b32.xlu1 %v1937_v19, %s2726_s23  ;;  %1940 = vrot.lane.b32.xlu0 %v4820_v52, %s2726_s23  ;;  %v2061_v19 = vsel %vm1045_vm6, %v4317_v57, %v2060_v63  ;;  %s2465_s23 = sshll.u32 %s2701_s19, 3  ;;  %s4508_s19 = scalar_lea.sflag [#allocation3], %s305_s5 }
  0xc7   : > { %2492 = vmatpush3.msra.mxu0 %v2176_v24  ;;  %2517 = vmatpush3.msra.mxu1 %v2176_v24  ;;  %s2296_s6 = sadd.s32 %s2465_s23, %s2464_s14 }
  0xc8   : > { %v4348_v54 = vpop.permute.xlu0 %1512  ;;  %2493 = vmatprep.subr.mxu0 %v2175_v7  ;;  %2510 = vmatprep.subr.mxu1 %v2175_v7  ;;  %s2466_s27 = sshll.u32 %s2296_s6, 7 }
  0xc9   : > { %2494 = vmatpush3.msra.mxu0 %v2175_v7  ;;  %2518 = vmatpush3.msra.mxu1 %v2175_v7  ;;  %s4504_s18 = scalar_lea.hbm %s4564_s4, %s2466_s27 }
  0xca   : > { %1993 = vrot.lane.b32.xlu1 %v4821_v6, %s2727_s24  ;;  %1989 = vrot.lane.b32.xlu0 %v4822_v28, %s2727_s24  ;;  %v1291_v45 = vpop.permute.xlu1 %1290  ;;  %v4831_v28 = vld [vmem:[#allocation17_spill] sm:$0xff] }
  0xcb   : > { %v2106_v32 = vsel %vm2103_vm9, %v4255_v27, %v1291_v45  ;;  %v2079_v27 = vsel %vm1035_vm1, %v2012_v15, %v4279_v18  ;;  %v1036_v15 = vsel %vm1035_vm1, %v4826_v43, %v910_v1  ;;  %vm2143_vm1 = vcmask 326656  }
  0xcc   : > { %v2080_v33 = vsel %vm1037_vm2, %v2016_v23, %v2079_v27  ;;  %v1038_v59 = vsel %vm1037_vm2, %v4828_v38, %v1036_v15  ;;  %vm2148_vm2 = vcmask 359424  }
  0xcd   : > { %v2081_v17 = vsel %vm1039_vm3, %v4314_v2, %v2080_v33  ;;  %v2173_v2 = vld [vmem:[%s4563_s3] sm:$0xff] }
  0xce   : > { %1995 = vrot.lane.b32.xlu1 %v1988_v55, %s2727_s24  ;;  %1991 = vrot.lane.b32.xlu0 %v4823_v21, %s2727_s24  ;;  %v2082_v20 = vsel %vm1041_vm4, %v4327_v4, %v2081_v17 }
  0xd0   : > { %v1289_v18 = vpop.permute.xlu0 %1288 }
  0xd2   : > { %2044 = vrot.lane.b32.xlu1 %v4825_v60, %s2728_s12  ;;  %2040 = vrot.lane.b32.xlu0 %v3981_v48, %s2728_s12  ;;  %v2105_v48 = vsel %vm2103_vm9, %v4290_v0, %v1289_v18  ;;  %v2055_v0 = vrot.slane %v4382_v34, %v2850_v8  ;;  %v2174_v8 = vld [vmem:[%s4563_s3 + $0x8] sm:$0xff] }
  0xd3   : > { %2495 = vmatprep.subr.mxu0 %v2174_v8  ;;  %2511 = vmatprep.subr.mxu1 %v2174_v8 }
  0xd4   : > { %v1293_v9 = vpop.permute.xlu1 %1292  ;;  %v2062_v57 = vsel %vm1047_vm7, %v2055_v0, %v2061_v19  ;;  %2496 = vmatpush3.msra.mxu0 %v2174_v8  ;;  %2519 = vmatpush3.msra.mxu1 %v2174_v8 }
  0xd5   : > { %v2107_v61 = vsel %vm2103_vm9, %v4304_v40, %v1293_v9  ;;  %v4829_v40 = vld [vmem:[#allocation14_spill] sm:$0xff]  ;;  %2497 = vmatprep.subr.mxu0 %v2173_v2  ;;  %2512 = vmatprep.subr.mxu1 %v2173_v2 }
  0xd6   : > { %2046 = vrot.lane.b32.xlu1 %v2039_v25, %s2728_s12  ;;  %2042 = vrot.lane.b32.xlu0 %v4827_v37, %s2728_s12  ;;  %v1345_v23 = vpop.permute.xlu0 %1344  ;;  %v1040_v3 = vsel %vm1039_vm3, %v4829_v40, %v1038_v59  ;;  %vm2153_vm3 = vcmask 392192   ;;  %s2437_s12 = sshll.u32 %s305_s5, 5 }
  0xd7   : > { %v2110_v29 = vsel %vm2108_vm10, %v2105_v48, %v1345_v23  ;;  %v1042_v4 = vsel %vm1041_vm4, %v4830_v53, %v1040_v3  ;;  %2498 = vmatpush3.msra.mxu0 %v2173_v2  ;;  %2520 = vmatpush3.msra.mxu1 %v2173_v2  ;;  %vm2158_vm4 = vcmask 424960   ;;  %s307_s13 = scalar_lea.vmem [#allocation2], %s2437_s12 }
  0xd8   : > { %v2115_v52 = vsel %vm2113_vm11, %v2110_v29, %v4348_v54  ;;  %v1347_v13 = vpop.permute.xlu1 %1346  ;;  %v1044_v26 = vsel %vm1043_vm5, %v4831_v28, %v1042_v4  ;;  %s2299_s24 = sshll.u32 %s307_s13, 4  ;;  %s4497_s24 = int_to_ptr.vmem [resolvable:$true] %s2299_s24 }
  0xd9   : > { %s2621_s9 = scalar_lea.vmem %s4497_s24, 512 }
  0xda   : > { %2067 = vrot.lane.b32.xlu1 %v4049_v41, %s2729_s30  ;;  %2063 = vrot.lane.b32.xlu0 %v4069_v50, %s2729_s30  ;;  %v2111_v41 = vsel %vm2108_vm10, %v2106_v32, %v1347_v13  ;;  %v2083_v50 = vsel %vm1043_vm5, %v4343_v35, %v2082_v20  ;;  %vm2163_vm5 = vcmask 457728   ;;  %p2622_p6 = scmp.ne.s32.totalorder %s4497_s24, %s2621_s9 }
  0xdb   : > { %v2116_v56 = vsel %vm2113_vm11, %v2111_v41, %v4324_v12  ;;  %v2084_v6 = vsel %vm1045_vm6, %v4355_v44, %v2083_v50  ;;  %v4832_v12 = vld [vmem:[#allocation78_spill] sm:$0xff] }
  0xdc   : > { %v1046_v16 = vsel %vm1045_vm6, %v4832_v12, %v1044_v26  ;;  %vm2168_vm6 = vcmask 490496   ;;  %p2623_p7 = pnand %p2622_p6, %p2809_p3 }
  0xdd   : > { %v1048_v46 = vsel %vm1047_vm7, %v4833_v39, %v1046_v16 }
  0xde   : > { %2069 = vrot.lane.b32.xlu1 %v2062_v57, %s2729_s30  ;;  %2065 = vrot.lane.b32.xlu0 %v3992_v11, %s2729_s30  ;;  %v1349_v58 = vpop.permute.xlu1 %1348  ;;  %v2085_v11 = vsel %vm1047_vm7, %v2078_v47, %v2084_v6  ;;  %vm2181_vm7 = vcmask 523264   ;;  %p2624_p9 = pneg %p2623_p7 }
  0xdf   : > { %v2112_v55 = vsel %vm2108_vm10, %v2107_v61, %v1349_v58 }
  0xe2   : > { %2090 = vrot.lane.b32.xlu1 %v4125_v42, %s2730_s10  ;;  %2086 = vrot.lane.b32.xlu0 %v4143_v30, %s2730_s10 }
  0xe3   : > { %v1231_v35 = vpop.permute.xlu0 %1230 }
  0xe4   : > { %v2099_v54 = vsel %vm2098_vm8, %v1048_v46, %v1231_v35 }
  0xe6   : > { %2092 = vrot.lane.b32.xlu1 %v2085_v11, %s2730_s10  ;;  %2088 = vrot.lane.b32.xlu0 %v4089_v22, %s2730_s10  ;;  %s2731_s10 = smov [#allocation2]  }
  0xe7   : > { %s2625_s12 = sshll.u32 %s2731_s10, 4  ;;  %s2626_s12 = int_to_ptr.vmem [resolvable:$false] %s2625_s12 }
  0xe8   : > { %v1287_v14 = vpop.permute.xlu0 %1286  ;;  %s2627_s14 = scalar_lea.vmem %s2626_s12, 1024  ;;  %p2628_p10 = scmp.lt.s32.totalorder %s4497_s24, %s2626_s12 }
  0xe9   : > { %v2104_v21 = vsel %vm2103_vm9, %v2099_v54, %v1287_v14  ;;  %p2629_p11 = scmp.lt.s32.totalorder %s2627_s14, %s2621_s9 }
  0xeb   : > { %p2630_p12 = por %p2629_p11, %p2628_p10 }
  0xed   : > { %v1343_v42 = vpop.permute.xlu0 %1342  ;;  %p2631_p13 = pnand %p2630_p12, %p2624_p9 }
  0xee   : > { %v2109_v30 = vsel %vm2108_vm10, %v2104_v21, %v1343_v42 }
  0xef   : > { %v2114_v45 = vsel %vm2113_vm11, %v2109_v30, %v4320_v31 }
  0xf0   : > { %v1517_v44 = vpop.permute.xlu1 %1516 }
  0xf1   : > { %v2117_v49 = vsel %vm2113_vm11, %v2112_v55, %v1517_v44 }
  0xf4   : > { %v1683_v32 = vpop.permute.xlu1 %1682 }
  0xf5   : > { %v2121_v22 = vsel %vm2118_vm12, %v2116_v56, %v1683_v32 }
  0xf8   : > { %v1679_v10 = vpop.permute.xlu0 %1678 }
  0xf9   : > { %v2119_v5 = vsel %vm2118_vm12, %v2114_v45, %v1679_v10 }
  0xfc   : > { %v1685_v36 = vpop.permute.xlu1 %1684 }
  0xfd   : > { %v2122_v1 = vsel %vm2118_vm12, %v2117_v49, %v1685_v36 }
 0x101   : > { %v1681_v51 = vpop.permute.xlu0 %1680 }
 0x102   : > { %v2120_v27 = vsel %vm2118_vm12, %v2115_v52, %v1681_v51  ;;  %v1739_v60 = vpop.permute.xlu1 %1738 }
 0x103   : > { %v2126_v50 = vsel %vm2123_vm13, %v2121_v22, %v1739_v60 }
 0x105   : > { %v1735_v62 = vpop.permute.xlu0 %1734 }
 0x106   : > { %v2124_v53 = vsel %vm2123_vm13, %v2119_v5, %v1735_v62 }
 0x108   : > { %v1741_v24 = vpop.permute.xlu1 %1740 }
 0x109   : > { %v2127_v11 = vsel %vm2123_vm13, %v2122_v1, %v1741_v24 }
 0x10a   : > { %v1737_v25 = vpop.permute.xlu0 %1736 }
 0x10b   : > { %v2125_v12 = vsel %vm2123_vm13, %v2120_v27, %v1737_v25 }
 0x10c   : > { %v1795_v34 = vpop.permute.xlu1 %1794 }
 0x10d   : > { %v2131_v47 = vsel %vm2128_vm14, %v2126_v50, %v1795_v34 }
 0x10f   : > { %v1791_v18 = vpop.permute.xlu0 %1790 }
 0x110   : > { %v1797_v33 = vpop.permute.xlu1 %1796  ;;  %v2129_v6 = vsel %vm2128_vm14, %v2124_v53, %v1791_v18 }
 0x111   : > { %v2132_v54 = vsel %vm2128_vm14, %v2127_v11, %v1797_v33 }
 0x113   : > { %v1793_v31 = vpop.permute.xlu0 %1792 }
 0x114   : > { %v2130_v14 = vsel %vm2128_vm14, %v2125_v12, %v1793_v31 }
 0x116   : > { %v1846_v48 = vpop.permute.xlu1 %1845 }
 0x117   : > { %v1842_v43 = vpop.permute.xlu0 %1841  ;;  %v2136_v28 = vsel %vm2133_vm15, %v2131_v47, %v1846_v48 }
 0x118   : > { %v2134_v26 = vsel %vm2133_vm15, %v2129_v6, %v1842_v43 }
 0x120   : > { %v1848_v15 = vpop.permute.xlu1 %1847  ;;  %v1844_v63 = vpop.permute.xlu0 %1843 }
 0x121   : > { %v2137_v30 = vsel %vm2133_vm15, %v2132_v54, %v1848_v15  ;;  %v2135_v45 = vsel %vm2133_vm15, %v2130_v14, %v1844_v63 }
 0x124   : > { %v1897_v7 = vpop.permute.xlu1 %1896  ;;  %v1893_v37 = vpop.permute.xlu0 %1892 }
 0x125   : > { %v2141_v58 = vsel %vm2138_vm0, %v2136_v28, %v1897_v7  ;;  %v2139_v55 = vsel %vm2138_vm0, %v2134_v26, %v1893_v37 }
 0x128   : > { %v1899_v0 = vpop.permute.xlu1 %1898  ;;  %v1895_v17 = vpop.permute.xlu0 %1894 }
 0x129   : > { %v2142_v32 = vsel %vm2138_vm0, %v2137_v30, %v1899_v0  ;;  %v2140_v22 = vsel %vm2138_vm0, %v2135_v45, %v1895_v17 }
 0x12c   : > { %v1920_v9 = vpop.permute.xlu1 %1919  ;;  %v1916_v38 = vpop.permute.xlu0 %1915 }
 0x12d   : > { %v2146_v16 = vsel %vm2143_vm1, %v2141_v58, %v1920_v9  ;;  %v2144_v35 = vsel %vm2143_vm1, %v2139_v55, %v1916_v38 }
 0x130   : > { %v1922_v59 = vpop.permute.xlu1 %1921  ;;  %v1918_v19 = vpop.permute.xlu0 %1917 }
 0x131   : > { %v2147_v36 = vsel %vm2143_vm1, %v2142_v32, %v1922_v59  ;;  %v2145_v1 = vsel %vm2143_vm1, %v2140_v22, %v1918_v19 }
 0x134   : > { %v1943_v61 = vpop.permute.xlu1 %1942  ;;  %v1939_v23 = vpop.permute.xlu0 %1938 }
 0x135   : > { %v2151_v21 = vsel %vm2148_vm2, %v2146_v16, %v1943_v61  ;;  %v2149_v42 = vsel %vm2148_vm2, %v2144_v35, %v1939_v23 }
 0x138   : > { %v1945_v8 = vpop.permute.xlu1 %1944  ;;  %v1941_v29 = vpop.permute.xlu0 %1940 }
 0x139   : > { %v2152_v24 = vsel %vm2148_vm2, %v2147_v36, %v1945_v8  ;;  %v2150_v25 = vsel %vm2148_vm2, %v2145_v1, %v1941_v29 }
 0x13c   : > { %v1994_v20 = vpop.permute.xlu1 %1993  ;;  %v1990_v40 = vpop.permute.xlu0 %1989 }
 0x13d   : > { %v2156_v44 = vsel %vm2153_vm3, %v2151_v21, %v1994_v20  ;;  %v2154_v49 = vsel %vm2153_vm3, %v2149_v42, %v1990_v40 }
 0x140   : > { %v1996_v3 = vpop.permute.xlu1 %1995  ;;  %v1992_v52 = vpop.permute.xlu0 %1991 }
 0x141   : > { %v2157_v33 = vsel %vm2153_vm3, %v2152_v24, %v1996_v3  ;;  %v2155_v31 = vsel %vm2153_vm3, %v2150_v25, %v1992_v52 }
 0x144   : > { %v2045_v2 = vpop.permute.xlu1 %2044  ;;  %v2041_v57 = vpop.permute.xlu0 %2040 }
 0x145   : > { %v2161_v10 = vsel %vm2158_vm4, %v2156_v44, %v2045_v2  ;;  %v2159_v5 = vsel %vm2158_vm4, %v2154_v49, %v2041_v57 }
 0x148   : > { %v2047_v13 = vpop.permute.xlu1 %2046  ;;  %v2043_v41 = vpop.permute.xlu0 %2042 }
 0x149   : > { %v2162_v48 = vsel %vm2158_vm4, %v2157_v33, %v2047_v13  ;;  %v2160_v43 = vsel %vm2158_vm4, %v2155_v31, %v2043_v41 }
 0x14c   : > { %v2068_v4 = vpop.permute.xlu1 %2067  ;;  %v2064_v56 = vpop.permute.xlu0 %2063 }
 0x14d   : > { %v2166_v51 = vsel %vm2163_vm5, %v2161_v10, %v2068_v4  ;;  %v2164_v27 = vsel %vm2163_vm5, %v2159_v5, %v2064_v56 }
 0x150   : > { %v2070_v39 = vpop.permute.xlu1 %2069  ;;  %v2066_v46 = vpop.permute.xlu0 %2065 }
 0x151   : > { %v2167_v15 = vsel %vm2163_vm5, %v2162_v48, %v2070_v39  ;;  %v2165_v63 = vsel %vm2163_vm5, %v2160_v43, %v2066_v46 }
 0x154   : > { %v2091_v60 = vpop.permute.xlu1 %2090  ;;  %v2087_v62 = vpop.permute.xlu0 %2086 }
 0x155   : > { %v2169_v34 = vsel %vm2168_vm6, %v2164_v27, %v2087_v62  ;;  %v2171_v18 = vsel %vm2168_vm6, %v2166_v51, %v2091_v60 }
 0x156   : > { %2499 = vmatprep.mubr.msk.f32.mxu0 %vm2181_vm7, %v2169_v34  ;;  %2502 = vmatprep.mubr.msk.f32.mxu1 %vm2181_vm7, %v2171_v18 }
 0x158   : > { %v2093_v7 = vpop.permute.xlu1 %2092  ;;  %v2089_v37 = vpop.permute.xlu0 %2088 }
 0x159   : > { %v2172_v0 = vsel %vm2168_vm6, %v2167_v15, %v2093_v7  ;;  %v2170_v17 = vsel %vm2168_vm6, %v2165_v63, %v2089_v37 }
 0x15a   : > { %2500 = vmatmul.mubr.msk.f32.vlgmr.msra.gmra.mxu0 %vm2181_vm7, %v2170_v17  ;;  %2503 = vmatmul.mubr.msk.f32.vlgmr.msra.gmra.mxu1 %vm2181_vm7, %v2172_v0 }
 0x21a   : > { %v2501_v9 = vpop.f32.mrf.mxu0  ;;  %v2504_v38 = vpop.f32.mrf.mxu1 }
 0x21b   : > { %2280 = vst.msk [vmem:[%s307_s13 + $0x8] sm:$0xff] %vm2103_vm9, %v2501_v9  ;;  %2282 = vst.msk [vmem:[%s307_s13 + $0x18] sm:$0xff] %vm2103_vm9, %v2504_v38 }
 0x21c   : > { %v2260_v59 = vpop.f32.mrf.mxu0  ;;  %v2270_v19 = vpop.f32.mrf.mxu1 }
 0x21d   : > { %2279 = vst.msk [vmem:[%s307_s13] sm:$0xff] %vm2103_vm9, %v2260_v59  ;;  %2281 = vst.msk [vmem:[%s307_s13 + $0x10] sm:$0xff] %vm2103_vm9, %v2270_v19 }
 0x21e   : > { %2634 = shalt.err (!%p2631_p13)
}
 0x21f   : > { %s2635_s5 = scalar_lea.hbm %s4504_s18, 512  ;;  %s2639_s13 = scalar_lea.hbm %s4564_s4, 2048 }
 0x220   : > { %p2636_p0 = scmp.ne.s32.totalorder %s4504_s18, %s2635_s5  ;;  %p2640_p4 = scmp.lt.s32.totalorder %s4504_s18, %s4564_s4 }
 0x221   : > { %p2641_p5 = scmp.lt.s32.totalorder %s2639_s13, %s2635_s5 }
 0x222   : > { %p2637_p1 = pnand %p2636_p0, %p2809_p3 }
 0x223   : > { %p2642_p6 = por %p2641_p5, %p2640_p4 }
 0x224   : > { %p2638_p2 = pneg %p2637_p1 }
 0x226   : > { %p2643_p7 = pnand %p2642_p6, %p2638_p2 }
 0x228   : > { %2646 = shalt.err (!%p2643_p7)
}
 0x229   : > { %s2732_s11 = smov 128  }
 0x22a   : > { %2521 = dma.vmem_to_hbm [thread:$0]  (%p2809_p3), %s4497_s24, 512, %s4504_s18, %s4508_s19, %s2732_s11, %s2732_s11, %s2718_s8  }
 0x22b PF: > { %p2527_p9 = scmp.ge.s32.totalorder %s2713_s22, 2  ;;  %s2314_s9 = sand.u32 1, %s2685_s15  }
 0x22c   : > { %s2315_s10 = scalar_lea.sflag [#allocation3], %s2314_s9 }
 0x22d   : > { %p2524_p10 = pnand %p2527_p9, %p2818_p8 }
 0x22f   : > { %p2525_p11 = pneg %p2524_p10 }
 0x231   : > { %2680 = dma.done.wait (%p2525_p11), %s2315_s10, 512  }
 0x232   : > { %2682 = vsyncadd (%p2525_p11), %s2315_s10, 4294966784  ;;  %s17_s22 = sadd.s32 1, %s2713_s22   ;;  %s4834_s15 = smov %s2689_s16 }
 0x233   : > { %p14_p12 = scmp.ge.s32.totalorder %s17_s22, 6   ;;  %s4835_s16 = smov %s2693_s17 }
 0x234   : > { %s4836_s17 = smov %s2827_s7  ;;  %s4837_s18 = smov %s2705_s20 }
 0x235   : > { %s4838_s19 = smov %s2709_s21  ;;  %s4839_s20 = smov %s4842_s25 }
 0x236   : > { %s4840_s21 = smov %s4846_s26  ;;  %16 = sbr.rel (!%p14_p12) target bundleno = 5 (0x5), region = 77 }
 0x23b   :  { %2320 = vsyncpa [#allocation3], 1 }
 0x23c   :  { %2322 = vsyncpa [#allocation3 + $0x1], 1 }

</bundles_post_ra>
